<compile_context>
chip_gen: v5e
topology: v5e:2x2
jax: 0.10.0
libtpu: 0.0.40
codegen_flags: <defaults>
</compile_context>

<pallas_src>
import functools

import jax
import jax.numpy as jnp
from jax.experimental import pallas as pl
from jax.experimental.pallas import tpu as pltpu


# ------------------------------ fused kernel --------------------------------

def _group_level_kernel(x_ref, wblk_ref, bblk_ref, wpred_ref, bpred_ref,
                        wmrg_ref, bmrg_ref, wfin_ref, bfin_ref,
                        final_ref, merged_ref, acc_ref, *, num_blocks):
    """One grid step = one row tile of one branch.

    Grid = (row_tiles, num_branches); branch axis is the reduction axis for the
    summed-prediction accumulator (acc_ref, VMEM scratch, f32).
    """
    b = pl.program_id(1)

    x_lo = x_ref[...]                       # (TP, C) low-precision matmul operand
    x_f32 = x_lo.astype(jnp.float32)

    # ----- branch block chain (BN scale folded into weights; epilogue in f32)
    feat = x_lo
    feat_f32 = x_f32
    for j in range(num_blocks):
        h = jnp.dot(feat, wblk_ref[0, 2 * j],
                    preferred_element_type=jnp.float32)
        h = jnp.maximum(h + bblk_ref[0, 2 * j], 0.0)
        y = jnp.dot(h.astype(x_lo.dtype), wblk_ref[0, 2 * j + 1],
                    preferred_element_type=jnp.float32)
        feat_f32 = jnp.maximum(y + bblk_ref[0, 2 * j + 1] + feat_f32, 0.0)
        feat = feat_f32.astype(x_lo.dtype)

    # ----- prediction head, pre-folded to the full joint width (scatter matrix
    #       folded into the weights), accumulated across branches in VMEM.
    pred_full = jnp.dot(feat, wpred_ref[0], preferred_element_type=jnp.float32)
    pred_full = pred_full + bpred_ref[0]

    @pl.when(b == 0)
    def _init():
        acc_ref[...] = jnp.zeros_like(acc_ref)

    acc_ref[...] += pred_full

    # ----- merged feature = x + feat @ (Wf + Wpred_s @ Wp) + folded bias
    merged = x_f32 + jnp.dot(feat, wmrg_ref[0],
                             preferred_element_type=jnp.float32) + bmrg_ref[0]
    merged_ref[...] = merged[None].astype(merged_ref.dtype)

    # ----- group_final_pred on the accumulated predictions (last branch only)
    @pl.when(b == pl.num_programs(1) - 1)
    def _finalize():
        fin = jnp.dot(acc_ref[...].astype(wfin_ref.dtype), wfin_ref[...],
                      preferred_element_type=jnp.float32) + bfin_ref[...]
        final_ref[...] = fin.astype(final_ref.dtype)


# ------------------------------ host wrapper ---------------------------------

def _pick_row_tile(P):
    # Largest tile that divides P while keeping >=2 row steps (v7x has 2 TCs).
    for t in (2048, 1024, 512, 256, 128, 64, 32, 16, 8):
        if P % t == 0 and P // t >= 2:
            return t
    return P


def derived_part_group_level_forward(x_nchw, folded, *, row_tile=None,
                                     matmul_dtype=jnp.bfloat16):
    B, C, H, W = x_nchw.shape
    P = B * H * W
    NB = folded["wblk"].shape[0]
    num_blocks = folded["wblk"].shape[1] // 2
    OC = folded["wfin"].shape[0]

    if row_tile is None:
        row_tile = _pick_row_tile(P)
    assert P % row_tile == 0, "B*H*W must be a multiple of the row tile"

    # NCHW -> NHWC -> (P, C); matmul operands in bf16, biases stay f32.
    x = jnp.transpose(x_nchw, (0, 2, 3, 1)).reshape(P, C).astype(matmul_dtype)
    wblk = folded["wblk"].astype(matmul_dtype)
    bblk = folded["bblk"].astype(jnp.float32)
    wpred = folded["wpred"].astype(matmul_dtype)
    bpred = folded["bpred"].astype(jnp.float32)
    wmrg = folded["wmrg"].astype(matmul_dtype)
    bmrg = folded["bmrg"].astype(jnp.float32)
    wfin = folded["wfin"].astype(matmul_dtype)
    bfin = folded["bfin"].astype(jnp.float32)

    grid = (P // row_tile, NB)

    flops = int(2 * P * NB * (num_blocks * 2 * C * C + C * OC + C * C)
                + 2 * P * OC * OC)
    bytes_accessed = int(
        x.size * x.dtype.itemsize
        + sum(int(a.size) * a.dtype.itemsize
              for a in (wblk, bblk, wpred, bpred, wmrg, bmrg, wfin, bfin))
        + P * OC * 4 + NB * P * C * 4)

    kernel = functools.partial(_group_level_kernel, num_blocks=num_blocks)
    final_flat, merged_flat = pl.pallas_call(
        kernel,
        out_shape=(jax.ShapeDtypeStruct((P, OC), jnp.float32),
                   jax.ShapeDtypeStruct((NB, P, C), jnp.float32)),
        grid_spec=pltpu.PrefetchScalarGridSpec(
            num_scalar_prefetch=0,
            grid=grid,
            in_specs=[
                pl.BlockSpec((row_tile, C), lambda i, b: (i, 0)),
                pl.BlockSpec((1, 2 * num_blocks, C, C),
                             lambda i, b: (b, 0, 0, 0)),
                pl.BlockSpec((1, 2 * num_blocks, 1, C),
                             lambda i, b: (b, 0, 0, 0)),
                pl.BlockSpec((1, C, OC), lambda i, b: (b, 0, 0)),
                pl.BlockSpec((1, 1, OC), lambda i, b: (b, 0, 0)),
                pl.BlockSpec((1, C, C), lambda i, b: (b, 0, 0)),
                pl.BlockSpec((1, 1, C), lambda i, b: (b, 0, 0)),
                pl.BlockSpec((OC, OC), lambda i, b: (0, 0)),
                pl.BlockSpec((1, OC), lambda i, b: (0, 0)),
            ],
            out_specs=[
                pl.BlockSpec((row_tile, OC), lambda i, b: (i, 0)),
                pl.BlockSpec((1, row_tile, C), lambda i, b: (b, i, 0)),
            ],
            scratch_shapes=[pltpu.VMEM((row_tile, OC), jnp.float32)],
        ),
        compiler_params=pltpu.CompilerParams(
            dimension_semantics=("parallel", "arbitrary")),
        cost_estimate=pl.CostEstimate(flops=flops, transcendentals=0,
                                      bytes_accessed=bytes_accessed),
    )(x, wblk, bblk, wpred, bpred, wmrg, bmrg, wfin, bfin)

    final_pred = jnp.transpose(final_flat.reshape(B, H, W, OC), (0, 3, 1, 2))
    merged_features = [
        jnp.transpose(merged_flat[i].reshape(B, H, W, C), (0, 3, 1, 2))
        for i in range(NB)
    ]
    return final_pred, merged_features


# ------------------------------- parameters ----------------------------------

def fold_bn(gamma, beta, mean, var, bias=None, eps=1e-5):
    scale = gamma / jnp.sqrt(var + eps)
    b = bias if bias is not None else jnp.zeros_like(gamma)
    shift = (b - mean) * scale + beta
    return scale, shift


class KeyGen:
    def __init__(self, key):
        self.key = key

    def __call__(self):
        self.key, sub = jax.random.split(self.key)
        return sub


def init_params(kg, channel, out_channel, num_branches, num_blocks, joints_used):
    def w(shape, s=0.1):
        return jax.random.normal(kg(), shape, jnp.float32) * s

    def bn(c):
        gamma = 1.0 + 0.1 * jax.random.normal(kg(), (c,), jnp.float32)
        beta = 0.1 * jax.random.normal(kg(), (c,), jnp.float32)
        mean = 0.1 * jax.random.normal(kg(), (c,), jnp.float32)
        var = 1.0 + 0.1 * jnp.abs(jax.random.normal(kg(), (c,), jnp.float32))
        return gamma, beta, mean, var

    params = {"branches": [], "preds": [], "mf": [], "mp": []}
    for i in range(num_branches):
        nj = len(joints_used[i])
        blocks = []
        for _ in range(num_blocks):
            s1, sh1 = fold_bn(*bn(channel))
            s2, sh2 = fold_bn(*bn(channel))
            blocks.append({"w1": w((channel, channel)), "s1": s1, "b1": sh1,
                           "w2": w((channel, channel)), "s2": s2, "b2": sh2})
        params["branches"].append(blocks)
        # pred head: conv1x1 (with bias) + BN, no ReLU
        pbias = 0.1 * jax.random.normal(kg(), (nj,), jnp.float32)
        ps, psh = fold_bn(*bn(nj), bias=pbias)
        params["preds"].append({"w": w((channel, nj)), "s": ps, "b": psh})
        # merge_features / merge_preds: conv1x1 with bias, no BN, no ReLU
        params["mf"].append({"w": w((channel, channel)),
                             "b": 0.1 * jax.random.normal(kg(), (channel,), jnp.float32)})
        params["mp"].append({"w": w((nj, channel)),
                             "b": 0.1 * jax.random.normal(kg(), (channel,), jnp.float32)})
    # group_final_pred: conv1x1 with bias, no BN, no ReLU
    params["final"] = {"w": w((out_channel, out_channel)),
                       "b": 0.1 * jax.random.normal(kg(), (out_channel,), jnp.float32)}
    return params


def fold_params(params, joints_used, channel, out_channel, num_blocks):
    """Host-side algebraic folding: BN scale into weights, pred-head scatter
    into a (C, out_channel) composite weight, merge_preds through the pred head."""
    NB = len(joints_used)
    wblk = jnp.zeros((NB, 2 * num_blocks, channel, channel), jnp.float32)
    bblk = jnp.zeros((NB, 2 * num_blocks, 1, channel), jnp.float32)
    wpred = jnp.zeros((NB, channel, out_channel), jnp.float32)
    bpred = jnp.zeros((NB, 1, out_channel), jnp.float32)
    wmrg = jnp.zeros((NB, channel, channel), jnp.float32)
    bmrg = jnp.zeros((NB, 1, channel), jnp.float32)

    for i in range(NB):
        for j, blk in enumerate(params["branches"][i]):
            wblk = wblk.at[i, 2 * j].set(blk["w1"] * blk["s1"][None, :])
            wblk = wblk.at[i, 2 * j + 1].set(blk["w2"] * blk["s2"][None, :])
            bblk = bblk.at[i, 2 * j, 0].set(blk["b1"])
            bblk = bblk.at[i, 2 * j + 1, 0].set(blk["b2"])

        pr = params["preds"][i]
        w_pred_s = pr["w"] * pr["s"][None, :]                     # (C, nj)
        shift_pred = pr["b"]                                      # (nj,)
        joints = jnp.asarray(joints_used[i])
        nj = len(joints_used[i])
        # one-hot scatter matrix to the full joint set (sum semantics across branches)
        S = jnp.zeros((nj, out_channel), jnp.float32).at[
            jnp.arange(nj), joints].set(1.0)
        wpred = wpred.at[i].set(w_pred_s @ S)
        bpred = bpred.at[i, 0].set(shift_pred @ S)

        mf, mp = params["mf"][i], params["mp"][i]
        wmrg = wmrg.at[i].set(mf["w"] + w_pred_s @ mp["w"])
        bmrg = bmrg.at[i, 0].set(mf["b"] + mp["b"] + shift_pred @ mp["w"])

    fin = params["final"]
    return {"wblk": wblk, "bblk": bblk, "wpred": wpred, "bpred": bpred,
            "wmrg": wmrg, "bmrg": bmrg,
            "wfin": fin["w"], "bfin": fin["b"].reshape(1, out_channel)}


# --------------------------- pure-JAX reference -------------------------------

def _ref_forward(x_nchw, params, joints_used, out_channel):
    """Unfused f32 reference following the original module dataflow."""
    B, C, H, W = x_nchw.shape
    P = B * H * W
    x = jnp.transpose(x_nchw, (0, 2, 3, 1)).reshape(P, C).astype(jnp.float32)

    def conv(a, w, s, b, relu):
        y = a @ w * s.reshape(1, -1) + b.reshape(1, -1)
        return jnp.maximum(y, 0.0) if relu else y

    summed = jnp.zeros((P, out_channel), jnp.float32)
    merged = []
    for i in range(len(joints_used)):
        feat = x
        for blk in params["branches"][i]:
            h = conv(feat, blk["w1"], blk["s1"], blk["b1"], True)
            feat = jnp.maximum(conv(h, blk["w2"], blk["s2"], blk["b2"], False) + feat, 0.0)
        pr = params["preds"][i]
        pred = conv(feat, pr["w"], pr["s"], pr["b"], False)
        summed = summed.at[:, jnp.asarray(joints_used[i])].add(pred)
        mg = (x
              + feat @ params["mf"][i]["w"] + params["mf"][i]["b"].reshape(1, -1)
              + pred @ params["mp"][i]["w"] + params["mp"][i]["b"].reshape(1, -1))
        merged.append(jnp.transpose(mg.reshape(B, H, W, C), (0, 3, 1, 2)))
    fin = params["final"]
    out = summed @ fin["w"] + fin["b"].reshape(1, -1)
    out = jnp.transpose(out.reshape(B, H, W, out_channel), (0, 3, 1, 2))
    return out, merged


# ----------------------------------- main -------------------------------------

if __name__ == "__main__":
    # Synthetic configuration (small, TPU-friendly).
    B, H, W = 2, 16, 16
    in_channel = channel = 32     # in_channel == channel (see note above)
    out_channel = 16
    num_branches = 2
    num_blocks = 1
    joints_used = [[0, 1, 2, 3, 4, 5, 6],
                   [7, 8, 9, 10, 11, 12, 13, 14, 15]]

    kg = KeyGen(jax.random.PRNGKey(0))
    params = init_params(kg, channel, out_channel, num_branches, num_blocks, joints_used)
    x = jax.random.normal(kg(), (B, in_channel, H, W), jnp.float32)

    folded = fold_params(params, joints_used, channel, out_channel, num_blocks)

    final_pred, merged_features = derived_part_group_level_forward(x, folded)
    final_pred = jax.block_until_ready(final_pred)
    merged_features = [jax.block_until_ready(m) for m in merged_features]

    # Validate against the unfused f32 reference (bf16 matmul operands in the
    # kernel -> looser tolerance than a pure-f32 path).
    ref_pred, ref_merged = _ref_forward(x, params, joints_used, out_channel)
    assert final_pred.shape == (B, out_channel, H, W)
    assert all(m.shape == (B, channel, H, W) for m in merged_features)
    assert jnp.allclose(final_pred, ref_pred, atol=3e-2, rtol=3e-2)
    for m, rm in zip(merged_features, ref_merged):
        assert jnp.allclose(m, rm, atol=3e-2, rtol=3e-2)

    print("KERNEL_OK")
</pallas_src>

<mosaic_0001>
module attributes {stable_mosaic.version = 11 : i64} {
  func.func @_group_level_kernel(%arg0: i32, %arg1: i32, %arg2: memref<256x32xbf16, #tpu.memory_space<vmem>>, %arg3: memref<1x2x32x32xbf16, #tpu.memory_space<vmem>>, %arg4: memref<1x2x1x32xf32, #tpu.memory_space<vmem>>, %arg5: memref<1x32x16xbf16, #tpu.memory_space<vmem>>, %arg6: memref<1x1x16xf32, #tpu.memory_space<vmem>>, %arg7: memref<1x32x32xbf16, #tpu.memory_space<vmem>>, %arg8: memref<1x1x32xf32, #tpu.memory_space<vmem>>, %arg9: memref<16x16xbf16, #tpu.memory_space<vmem>>, %arg10: memref<1x16xf32, #tpu.memory_space<vmem>>, %arg11: memref<256x16xf32, #tpu.memory_space<vmem>>, %arg12: memref<1x256x32xf32, #tpu.memory_space<vmem>>, %arg13: memref<256x16xf32, #tpu.memory_space<vmem>>) attributes {dimension_semantics = [#tpu.dimension_semantics<parallel>, #tpu.dimension_semantics<arbitrary>], iteration_bounds = array<i64: 2, 2>, scalar_prefetch = 0 : i64, scratch_operands = 1 : i64, tpu.core_type = #tpu.core_type<tc>, window_params = [{transform_indices = @transform_0, window_bounds = array<i64: 256, 32>}, {transform_indices = @transform_1, window_bounds = array<i64: 1, 2, 32, 32>}, {transform_indices = @transform_2, window_bounds = array<i64: 1, 2, 1, 32>}, {transform_indices = @transform_3, window_bounds = array<i64: 1, 32, 16>}, {transform_indices = @transform_4, window_bounds = array<i64: 1, 1, 16>}, {transform_indices = @transform_5, window_bounds = array<i64: 1, 32, 32>}, {transform_indices = @transform_6, window_bounds = array<i64: 1, 1, 32>}, {pipeline_mode = #tpu.pipeline_mode<synchronous>, transform_indices = @transform_7, window_bounds = array<i64: 16, 16>}, {pipeline_mode = #tpu.pipeline_mode<synchronous>, transform_indices = @transform_8, window_bounds = array<i64: 1, 16>}, {transform_indices = @transform_9, window_bounds = array<i64: 256, 16>}, {transform_indices = @transform_10, window_bounds = array<i64: 1, 256, 32>}]} {
    %c0 = arith.constant 0 : index
    %c0_0 = arith.constant 0 : index
    %0 = vector.load %arg2[%c0, %c0_0] : memref<256x32xbf16, #tpu.memory_space<vmem>>, vector<256x32xbf16>
    %1 = arith.extf %0 : vector<256x32xbf16> to vector<256x32xf32>
    %c0_1 = arith.constant 0 : index
    %c0_2 = arith.constant 0 : index
    %c0_3 = arith.constant 0 : index
    %c0_4 = arith.constant 0 : index
    %2 = vector.load %arg3[%c0_1, %c0_2, %c0_3, %c0_4] : memref<1x2x32x32xbf16, #tpu.memory_space<vmem>>, vector<1x1x32x32xbf16>
    %3 = vector.shape_cast %2 : vector<1x1x32x32xbf16> to vector<32x32xbf16>
    %cst = arith.constant dense<0.000000e+00> : vector<256x32xf32>
    %4 = tpu.matmul %0, %3, %cst {dimension_numbers = #tpu.dot_dimension_numbers<[1], [0], [0], [1], [0, 0, 1, 1], [], []>} : vector<256x32xbf16>, vector<32x32xbf16>, vector<256x32xf32> -> vector<256x32xf32>
    %c0_5 = arith.constant 0 : index
    %c0_6 = arith.constant 0 : index
    %c0_7 = arith.constant 0 : index
    %c0_8 = arith.constant 0 : index
    %5 = vector.load %arg4[%c0_5, %c0_6, %c0_7, %c0_8] : memref<1x2x1x32xf32, #tpu.memory_space<vmem>>, vector<1x1x1x32xf32>
    %6 = vector.shape_cast %5 : vector<1x1x1x32xf32> to vector<1x32xf32>
    %7 = vector.broadcast %6 : vector<1x32xf32> to vector<256x32xf32>
    %8 = arith.addf %4, %7 : vector<256x32xf32>
    %cst_9 = arith.constant 0.000000e+00 : f32
    %9 = vector.broadcast %cst_9 : f32 to vector<256x32xf32>
    %10 = arith.maximumf %8, %9 : vector<256x32xf32>
    %11 = arith.truncf %10 : vector<256x32xf32> to vector<256x32xbf16>
    %c0_10 = arith.constant 0 : index
    %c1 = arith.constant 1 : index
    %c0_11 = arith.constant 0 : index
    %c0_12 = arith.constant 0 : index
    %12 = vector.load %arg3[%c0_10, %c1, %c0_11, %c0_12] : memref<1x2x32x32xbf16, #tpu.memory_space<vmem>>, vector<1x1x32x32xbf16>
    %13 = vector.shape_cast %12 : vector<1x1x32x32xbf16> to vector<32x32xbf16>
    %cst_13 = arith.constant dense<0.000000e+00> : vector<256x32xf32>
    %14 = tpu.matmul %11, %13, %cst_13 {dimension_numbers = #tpu.dot_dimension_numbers<[1], [0], [0], [1], [0, 0, 1, 1], [], []>} : vector<256x32xbf16>, vector<32x32xbf16>, vector<256x32xf32> -> vector<256x32xf32>
    %c0_14 = arith.constant 0 : index
    %c1_15 = arith.constant 1 : index
    %c0_16 = arith.constant 0 : index
    %c0_17 = arith.constant 0 : index
    %15 = vector.load %arg4[%c0_14, %c1_15, %c0_16, %c0_17] : memref<1x2x1x32xf32, #tpu.memory_space<vmem>>, vector<1x1x1x32xf32>
    %16 = vector.shape_cast %15 : vector<1x1x1x32xf32> to vector<1x32xf32>
    %17 = vector.broadcast %16 : vector<1x32xf32> to vector<256x32xf32>
    %18 = arith.addf %14, %17 : vector<256x32xf32>
    %19 = arith.addf %18, %1 : vector<256x32xf32>
    %cst_18 = arith.constant 0.000000e+00 : f32
    %20 = vector.broadcast %cst_18 : f32 to vector<256x32xf32>
    %21 = arith.maximumf %19, %20 : vector<256x32xf32>
    %22 = arith.truncf %21 : vector<256x32xf32> to vector<256x32xbf16>
    %c0_19 = arith.constant 0 : index
    %c0_20 = arith.constant 0 : index
    %c0_21 = arith.constant 0 : index
    %23 = vector.load %arg5[%c0_19, %c0_20, %c0_21] : memref<1x32x16xbf16, #tpu.memory_space<vmem>>, vector<1x32x16xbf16>
    %24 = vector.shape_cast %23 : vector<1x32x16xbf16> to vector<32x16xbf16>
    %cst_22 = arith.constant dense<0.000000e+00> : vector<256x16xf32>
    %25 = tpu.matmul %22, %24, %cst_22 {dimension_numbers = #tpu.dot_dimension_numbers<[1], [0], [0], [1], [0, 0, 1, 1], [], []>} : vector<256x32xbf16>, vector<32x16xbf16>, vector<256x16xf32> -> vector<256x16xf32>
    %c0_23 = arith.constant 0 : index
    %c0_24 = arith.constant 0 : index
    %c0_25 = arith.constant 0 : index
    %26 = vector.load %arg6[%c0_23, %c0_24, %c0_25] : memref<1x1x16xf32, #tpu.memory_space<vmem>>, vector<1x1x16xf32>
    %27 = vector.shape_cast %26 : vector<1x1x16xf32> to vector<1x16xf32>
    %28 = vector.broadcast %27 : vector<1x16xf32> to vector<256x16xf32>
    %29 = arith.addf %25, %28 : vector<256x16xf32>
    %c0_i32 = arith.constant 0 : i32
    %30 = arith.cmpi eq, %arg1, %c0_i32 : i32
    %31 = arith.extui %30 : i1 to i32
    %c0_i32_26 = arith.constant 0 : i32
    %32 = arith.cmpi ne, %31, %c0_i32_26 : i32
    scf.if %32 {
      %cst_42 = arith.constant 0.000000e+00 : f32
      %49 = vector.broadcast %cst_42 : f32 to vector<256x16xf32>
      %c0_43 = arith.constant 0 : index
      %c0_44 = arith.constant 0 : index
      %50 = vector.load %arg13[%c0_43, %c0_44] : memref<256x16xf32, #tpu.memory_space<vmem>>, vector<256x16xf32>
      tpu.vector_store %arg13[%c0_43, %c0_44], %49 {strides = array<i32>} : memref<256x16xf32, #tpu.memory_space<vmem>>, vector<256x16xf32>,
    } else {
    }
    %c0_27 = arith.constant 0 : index
    %c0_28 = arith.constant 0 : index
    %33 = vector.load %arg13[%c0_27, %c0_28] : memref<256x16xf32, #tpu.memory_space<vmem>>, vector<256x16xf32>
    %34 = arith.addf %33, %29 : vector<256x16xf32>
    %c0_29 = arith.constant 0 : index
    %c0_30 = arith.constant 0 : index
    %35 = vector.load %arg13[%c0_29, %c0_30] : memref<256x16xf32, #tpu.memory_space<vmem>>, vector<256x16xf32>
    tpu.vector_store %arg13[%c0_29, %c0_30], %34 {strides = array<i32>} : memref<256x16xf32, #tpu.memory_space<vmem>>, vector<256x16xf32>,
    %c0_31 = arith.constant 0 : index
    %c0_32 = arith.constant 0 : index
    %c0_33 = arith.constant 0 : index
    %36 = vector.load %arg7[%c0_31, %c0_32, %c0_33] : memref<1x32x32xbf16, #tpu.memory_space<vmem>>, vector<1x32x32xbf16>
    %37 = vector.shape_cast %36 : vector<1x32x32xbf16> to vector<32x32xbf16>
    %cst_34 = arith.constant dense<0.000000e+00> : vector<256x32xf32>
    %38 = tpu.matmul %22, %37, %cst_34 {dimension_numbers = #tpu.dot_dimension_numbers<[1], [0], [0], [1], [0, 0, 1, 1], [], []>} : vector<256x32xbf16>, vector<32x32xbf16>, vector<256x32xf32> -> vector<256x32xf32>
    %39 = arith.addf %1, %38 : vector<256x32xf32>
    %c0_35 = arith.constant 0 : index
    %c0_36 = arith.constant 0 : index
    %c0_37 = arith.constant 0 : index
    %40 = vector.load %arg8[%c0_35, %c0_36, %c0_37] : memref<1x1x32xf32, #tpu.memory_space<vmem>>, vector<1x1x32xf32>
    %41 = vector.shape_cast %40 : vector<1x1x32xf32> to vector<1x32xf32>
    %42 = vector.broadcast %41 : vector<1x32xf32> to vector<256x32xf32>
    %43 = arith.addf %39, %42 : vector<256x32xf32>
    %44 = vector.shape_cast %43 : vector<256x32xf32> to vector<1x256x32xf32>
    %c0_38 = arith.constant 0 : index
    %c0_39 = arith.constant 0 : index
    %c0_40 = arith.constant 0 : index
    %45 = vector.load %arg12[%c0_38, %c0_39, %c0_40] : memref<1x256x32xf32, #tpu.memory_space<vmem>>, vector<1x256x32xf32>
    tpu.vector_store %arg12[%c0_38, %c0_39, %c0_40], %44 {strides = array<i32>} : memref<1x256x32xf32, #tpu.memory_space<vmem>>, vector<1x256x32xf32>,
    %c1_i32 = arith.constant 1 : i32
    %46 = arith.cmpi eq, %arg1, %c1_i32 : i32
    %47 = arith.extui %46 : i1 to i32
    %c0_i32_41 = arith.constant 0 : i32
    %48 = arith.cmpi ne, %47, %c0_i32_41 : i32
    scf.if %48 {
      %c0_42 = arith.constant 0 : index
      %c0_43 = arith.constant 0 : index
      %49 = vector.load %arg13[%c0_42, %c0_43] : memref<256x16xf32, #tpu.memory_space<vmem>>, vector<256x16xf32>
      %50 = arith.truncf %49 : vector<256x16xf32> to vector<256x16xbf16>
      %c0_44 = arith.constant 0 : index
      %c0_45 = arith.constant 0 : index
      %51 = vector.load %arg9[%c0_44, %c0_45] : memref<16x16xbf16, #tpu.memory_space<vmem>>, vector<16x16xbf16>
      %cst_46 = arith.constant dense<0.000000e+00> : vector<256x16xf32>
      %52 = tpu.matmul %50, %51, %cst_46 {dimension_numbers = #tpu.dot_dimension_numbers<[1], [0], [0], [1], [0, 0, 1, 1], [], []>} : vector<256x16xbf16>, vector<16x16xbf16>, vector<256x16xf32> -> vector<256x16xf32>
      %c0_47 = arith.constant 0 : index
      %c0_48 = arith.constant 0 : index
      %53 = vector.load %arg10[%c0_47, %c0_48] : memref<1x16xf32, #tpu.memory_space<vmem>>, vector<1x16xf32>
      %54 = vector.broadcast %53 : vector<1x16xf32> to vector<256x16xf32>
      %55 = arith.addf %52, %54 : vector<256x16xf32>
      %c0_49 = arith.constant 0 : index
      %c0_50 = arith.constant 0 : index
      %56 = vector.load %arg11[%c0_49, %c0_50] : memref<256x16xf32, #tpu.memory_space<vmem>>, vector<256x16xf32>
      tpu.vector_store %arg11[%c0_49, %c0_50], %55 {strides = array<i32>} : memref<256x16xf32, #tpu.memory_space<vmem>>, vector<256x16xf32>,
    } else {
    }
    return
  }
  func.func @transform_0(%arg0: i32, %arg1: i32) -> (i32, i32) {
    %c0_i32 = arith.constant 0 : i32
    %c0_i32_0 = arith.constant 0 : i32
    return %arg0, %c0_i32 : i32, i32
  }
  func.func @transform_1(%arg0: i32, %arg1: i32) -> (i32, i32, i32, i32) {
    %c0_i32 = arith.constant 0 : i32
    %c0_i32_0 = arith.constant 0 : i32
    %c0_i32_1 = arith.constant 0 : i32
    %c0_i32_2 = arith.constant 0 : i32
    return %arg1, %c0_i32, %c0_i32_0, %c0_i32_1 : i32, i32, i32, i32
  }
  func.func @transform_2(%arg0: i32, %arg1: i32) -> (i32, i32, i32, i32) {
    %c0_i32 = arith.constant 0 : i32
    %c0_i32_0 = arith.constant 0 : i32
    %c0_i32_1 = arith.constant 0 : i32
    %c0_i32_2 = arith.constant 0 : i32
    return %arg1, %c0_i32, %c0_i32_0, %c0_i32_1 : i32, i32, i32, i32
  }
  func.func @transform_3(%arg0: i32, %arg1: i32) -> (i32, i32, i32) {
    %c0_i32 = arith.constant 0 : i32
    %c0_i32_0 = arith.constant 0 : i32
    %c0_i32_1 = arith.constant 0 : i32
    return %arg1, %c0_i32, %c0_i32_0 : i32, i32, i32
  }
  func.func @transform_4(%arg0: i32, %arg1: i32) -> (i32, i32, i32) {
    %c0_i32 = arith.constant 0 : i32
    %c0_i32_0 = arith.constant 0 : i32
    %c0_i32_1 = arith.constant 0 : i32
    return %arg1, %c0_i32, %c0_i32_0 : i32, i32, i32
  }
  func.func @transform_5(%arg0: i32, %arg1: i32) -> (i32, i32, i32) {
    %c0_i32 = arith.constant 0 : i32
    %c0_i32_0 = arith.constant 0 : i32
    %c0_i32_1 = arith.constant 0 : i32
    return %arg1, %c0_i32, %c0_i32_0 : i32, i32, i32
  }
  func.func @transform_6(%arg0: i32, %arg1: i32) -> (i32, i32, i32) {
    %c0_i32 = arith.constant 0 : i32
    %c0_i32_0 = arith.constant 0 : i32
    %c0_i32_1 = arith.constant 0 : i32
    return %arg1, %c0_i32, %c0_i32_0 : i32, i32, i32
  }
  func.func @transform_7(%arg0: i32, %arg1: i32) -> (i32, i32) {
    %c0_i32 = arith.constant 0 : i32
    %c0_i32_0 = arith.constant 0 : i32
    %c0_i32_1 = arith.constant 0 : i32
    return %c0_i32, %c0_i32_0 : i32, i32
  }
  func.func @transform_8(%arg0: i32, %arg1: i32) -> (i32, i32) {
    %c0_i32 = arith.constant 0 : i32
    %c0_i32_0 = arith.constant 0 : i32
    %c0_i32_1 = arith.constant 0 : i32
    return %c0_i32, %c0_i32_0 : i32, i32
  }
  func.func @transform_9(%arg0: i32, %arg1: i32) -> (i32, i32) {
    %c0_i32 = arith.constant 0 : i32
    %c0_i32_0 = arith.constant 0 : i32
    return %arg0, %c0_i32 : i32, i32
  }
  func.func @transform_10(%arg0: i32, %arg1: i32) -> (i32, i32, i32) {
    %c0_i32 = arith.constant 0 : i32
    %c0_i32_0 = arith.constant 0 : i32
    return %arg1, %arg0, %c0_i32 : i32, i32, i32
  }
}

</mosaic_0001>

<bundles_post_ra>
// kernel: tpu_custom_call.1
= control target key start
LH: loop header
LB: loop body
LE: loop exit
PB: predicated region body
PF: predicated region fallthrough
CT: control target
= control target key end

     0   :  { %s2388_s13 = smov 0   ;;  %s2390_s14 = smov 0   ;;  %s3340_s0 = inlined_call_operand.vmem [shape: bf16[512,32], index: 0, kind: input, shape index: {}]   ;;  %s3341_s1 = inlined_call_operand.vmem [shape: bf16[2,2,32,32], index: 1, kind: input, shape index: {}]   ;;  %s3342_s2 = inlined_call_operand.vmem [shape: f32[2,2,1,32], index: 2, kind: input, shape index: {}]   ;;  %s3343_s3 = inlined_call_operand.vmem [shape: bf16[2,32,16], index: 3, kind: input, shape index: {}]   ;;  %s3344_s4 = inlined_call_operand.vmem [shape: f32[2,1,16], index: 4, kind: input, shape index: {}]   ;;  %s3345_s5 = inlined_call_operand.vmem [shape: bf16[2,32,32], index: 5, kind: input, shape index: {}]   ;;  %s3346_s6 = inlined_call_operand.vmem [shape: f32[2,1,32], index: 6, kind: input, shape index: {}]   ;;  %s3347_s7 = inlined_call_operand.vmem [shape: bf16[16,16], index: 7, kind: input, shape index: {}]   ;;  %s3348_s8 = inlined_call_operand.vmem [shape: f32[1,16], index: 8, kind: input, shape index: {}]   ;;  %s3349_s9 = inlined_call_operand.vmem [shape: f32[512,16], index: 9, kind: output, shape index: {0}]   ;;  %s3350_s10 = inlined_call_operand.vmem [shape: f32[2,512,32], index: 10, kind: output, shape index: {1}]  }
   0x1   :  { %3411 = sst [smem:[#allocation20_spill]] %s3340_s0  ;;  %s2392_s15 = smov 0  }
   0x2   :  { %3412 = sst [smem:[#allocation21_spill]] %s3341_s1  ;;  %s2394_s16 = smov 0  }
   0x3   :  { %s2396_s17 = smov 0  }
   0x4 LB: > { %s30_s18 = sadd.s32 1, %s2322_s15  ;;  %s33_s19 = sadd.s32 1, %s2326_s16  ;;  %s2330_s17 = sphi %s2396_s17, %s21_s17   ;;  %s2326_s16 = sphi %s2394_s16, %s3484_s16   ;;  %s2322_s15 = sphi %s2392_s15, %s3483_s15   ;;  %s2318_s14 = sphi %s2390_s14, %s3482_s14   ;;  %s2314_s13 = sphi %s2388_s13, %s3481_s13  }
   0x5   : > { %p31_p0 = scmp.ge.s32.totalorder %s30_s18, 2  ;;  %p2011_p1 = scmp.ge.s32.totalorder %s2330_s17, 1 }
   0x6   : > { %p385_p2 = scmp.lt.s32.totalorder %s2330_s17, 5 }
   0x7   : > { %s3486_s18 = smov (%p31_p0, %s30_s18), 0  ;;  %s3488_s19 = smov (!%p31_p0, %s33_s19), %s2326_s16 }
   0x8   : > { %p386_p3 = pnand %p2011_p1, %p385_p2  ;;  %p35_p4 = scmp.ge.s32.totalorder %s3488_s19, 2 }
   0xa   : > { %s3490_s19 = smov (%p35_p4, %s3488_s19), 0  ;;  %389 = sbr.rel (%p386_p3) target bundleno = 1323 (0x52b), region = 56 }
   0xb   : > { %3413 = sst [smem:[#allocation3_spill]] %s3490_s19 }
   0xf   : > { %p463_p5 = scmp.lt.s32.totalorder %s2314_s13, 1  ;;  %s2012_s20 = sshll.u32 %s2318_s14, 5  ;;  %vm669_vm0 = vcmask 261120  }
  0x10   : > { %p458_p6 = scmp.lt.s32.totalorder %s2012_s20, 63  ;;  %s3414_s1 = sld [smem:[#allocation21_spill]] }
  0x11   : > { %s2422_s21 = scalar_select %p463_p5, %s2314_s13, 1 }
  0x12   : > { %s3492_s20 = smov (!%p458_p6, %s2012_s20), 63  ;;  %s3415_s0 = sld [smem:[#allocation20_spill]] }
  0x13   : > { %s2215_s22 = sshll.u32 %s2422_s21, 5  ;;  %s2024_s23 = sshll.u32 %s2422_s21, 6 }
  0x14   : > { %s2013_s27 = sshll.u32 %s3492_s20, 2  ;;  %s2022_s11 = sshll.u32 %s3492_s20, 3 }
  0x15   : > { %s2440_s19 = scalar_lea.vmem %s3349_s9, %s2022_s11  ;;  %s2016_s25 = sshll.u32 %s2422_s21, 1 }
  0x16   : > { %s2429_s26 = scalar_lea.vmem %s3414_s1, %s2215_s22  ;;  %s500_s22 = sadd.s32 %s2024_s23, %s3492_s20 }
  0x17   : > { %v2235_v0 = vld [vmem:[%s2429_s26 + $0x8] sm:$0xff]  ;;  %v2234_v1 = vld [vmem:[%s2429_s26] sm:$0xff]  ;;  %s2025_s24 = sshll.u32 %s500_s22, 3  ;;  %s2452_s12 = scalar_lea.vmem %s3342_s2, %s2016_s25  ;;  %v2237_v9 = vld [vmem:[%s2429_s26 + $0x18] sm:$0xff] }
  0x18   : > { %s2435_s30 = scalar_lea.vmem %s3415_s0, %s2013_s27  ;;  %724 = vmatpush.bf16.msra.mxu0 %v2235_v0  ;;  %s2447_s29 = scalar_lea.vmem %s3350_s10, %s2025_s24  ;;  %931 = vmatpush.bf16.msra.mxu1 %v2237_v9  ;;  %v2236_v10 = vld [vmem:[%s2429_s26 + $0x10] sm:$0xff]  ;;  %v2474_v14 = vld [vmem:[%s2452_s12] ss:$0 sm:$0xff] }
  0x19   : > { %v2218_v2 = vld [vmem:[%s2435_s30] sm:$0xff]  ;;  %v2219_v3 = vld [vmem:[%s2435_s30 + $0x8] sm:$0xff]  ;;  %v2220_v4 = vld [vmem:[%s2435_s30 + $0x10] sm:$0xff]  ;;  %s2216_s0 = sshll.u32 %s2422_s21, 4  ;;  %s487_s14 = scalar_lea.vmem %s3346_s6, %s2422_s21 }
  0x1a   : > { %v2221_v5 = vld [vmem:[%s2435_s30 + $0x18] sm:$0xff]  ;;  %v2222_v6 = vld [vmem:[%s2435_s30 + $0x20] sm:$0xff]  ;;  %v2223_v7 = vld [vmem:[%s2435_s30 + $0x28] sm:$0xff]  ;;  %s2490_s23 = scalar_lea.vmem %s3345_s5, %s2216_s0  ;;  %s476_s25 = scalar_lea.vmem %s3343_s3, %s2216_s0 }
  0x1b   : > { %v2224_v8 = vld [vmem:[%s2435_s30 + $0x30] sm:$0xff]  ;;  %v2225_v11 = vld [vmem:[%s2435_s30 + $0x38] sm:$0xff]  ;;  %v2226_v12 = vld [vmem:[%s2435_s30 + $0x40] sm:$0xff]  ;;  %p2167_p7 = scmp.ne.s32.totalorder %s2314_s13, 0 }
  0x1c   : > { %725 = vmatpush.bf16.msra.mxu0 %v2234_v1  ;;  %932 = vmatpush.bf16.msra.mxu1 %v2236_v10  ;;  %v2227_v21 = vld [vmem:[%s2435_s30 + $0x48] sm:$0xff]  ;;  %v2228_v29 = vld [vmem:[%s2435_s30 + $0x50] sm:$0xff]  ;;  %v2229_v37 = vld [vmem:[%s2435_s30 + $0x58] sm:$0xff] }
  0x1d   : > { %v2230_v45 = vld [vmem:[%s2435_s30 + $0x60] sm:$0xff]  ;;  %v2231_v53 = vld [vmem:[%s2435_s30 + $0x68] sm:$0xff]  ;;  %v2232_v61 = vld [vmem:[%s2435_s30 + $0x70] sm:$0xff] }
  0x1e   : > { %v2238_v10 = vld [vmem:[%s476_s25] sm:$0xff] }
  0x1f   : > { %2098 = vmatmul.msk.bf16.vlgmr.msra.gmra.mxu0 %vm669_vm0, %v2218_v2 }
  0x2f   : > { %2099 = vmatmul.msk.bf16.gmra.mxu0 %vm669_vm0, %v2219_v3 }
  0x3f   : > { %2100 = vmatmul.msk.bf16.gmra.mxu0 %vm669_vm0, %v2220_v4 }
  0x4f   : > { %2101 = vmatmul.msk.bf16.gmra.mxu0 %vm669_vm0, %v2221_v5  ;;  %v2233_v5 = vld [vmem:[%s2435_s30 + $0x78] sm:$0xff] }
  0x5f   : > { %2102 = vmatmul.msk.bf16.gmra.mxu0 %vm669_vm0, %v2222_v6 }
  0x6f   : > { %2103 = vmatmul.msk.bf16.gmra.mxu0 %vm669_vm0, %v2223_v7  ;;  %v2239_v7 = vld [vmem:[%s476_s25 + $0x8] sm:$0xff] }
  0x70   : > { %1168 = vmatpush.bf16.msra.mxu2 %v2239_v7 }
  0x74   : > { %1169 = vmatpush.bf16.msra.mxu2 %v2238_v10 }
  0x7f   : > { %2104 = vmatmul.msk.bf16.gmra.mxu0 %vm669_vm0, %v2224_v8 }
  0x8f   : > { %2105 = vmatmul.msk.bf16.gmra.mxu0 %vm669_vm0, %v2225_v11 }
  0x9c   : > { %v727_v13 = vpop.f32.mrf.mxu0 }
  0x9d   : > { %v728_v15 = vadd.f32 %v2474_v14, %v727_v13 }
  0x9f   : > { %2106 = vmatmul.msk.bf16.gmra.mxu0 %vm669_vm0, %v2226_v12  ;;  %v807_v18 = vmax.f32 %v728_v15, 0.0 }
  0xa4   : > { %v729_v16 = vpop.f32.mrf.mxu0 }
  0xa5   : > { %v730_v17 = vadd.f32 %v2474_v14, %v729_v16 }
  0xa7   : > { %v808_v19 = vmax.f32 %v730_v17, 0.0 }
  0xa9   : > { %v839_v20 = vpack.c.bf16 %v808_v19, %v807_v18 }
  0xab   : > { %2127 = vmatmul.msk.bf16.vlgmr.msra.gmra.mxu1 %vm669_vm0, %v839_v20 }
  0xac   : > { %v732_v22 = vpop.f32.mrf.mxu0 }
  0xad   : > { %v733_v23 = vadd.f32 %v2474_v14, %v732_v22 }
  0xaf   : > { %2107 = vmatmul.msk.bf16.gmra.mxu0 %vm669_vm0, %v2227_v21  ;;  %v809_v26 = vmax.f32 %v733_v23, 0.0 }
  0xb4   : > { %v734_v24 = vpop.f32.mrf.mxu0 }
  0xb5   : > { %v735_v25 = vadd.f32 %v2474_v14, %v734_v24  ;;  %v2535_v24 = vld [vmem:[%s2452_s12 + $0x1] ss:$0 sm:$0xff]  ;;  %s479_s12 = scalar_lea.vmem %s3344_s4, %s2422_s21 }
  0xb7   : > { %v810_v27 = vmax.f32 %v735_v25, 0.0  ;;  %v2538_v25 = vld [vmem:[%s2435_s30] sm:$0xff]  }
  0xb9   : > { %v840_v28 = vpack.c.bf16 %v810_v27, %v809_v26  ;;  %v3382_v27 = vunpack.c.l.bf16 %v2538_v25 }
  0xbb   : > { %2128 = vmatmul.msk.bf16.gmra.mxu1 %vm669_vm0, %v840_v28 }
  0xbc   : > { %v737_v30 = vpop.f32.mrf.mxu0 }
  0xbd   : > { %v738_v31 = vadd.f32 %v2474_v14, %v737_v30 }
  0xbf   : > { %2108 = vmatmul.msk.bf16.gmra.mxu0 %vm669_vm0, %v2228_v29  ;;  %v811_v34 = vmax.f32 %v738_v31, 0.0  ;;  %v3381_v29 = vunpack.c.h.bf16 %v2538_v25 }
  0xc4   : > { %v739_v32 = vpop.f32.mrf.mxu0 }
  0xc5   : > { %v740_v33 = vadd.f32 %v2474_v14, %v739_v32 }
  0xc7   : > { %v812_v35 = vmax.f32 %v740_v33, 0.0 }
  0xc9   : > { %v841_v36 = vpack.c.bf16 %v812_v35, %v811_v34 }
  0xcb   : > { %2129 = vmatmul.msk.bf16.gmra.mxu1 %vm669_vm0, %v841_v36 }
  0xcc   : > { %v742_v38 = vpop.f32.mrf.mxu0 }
  0xcd   : > { %v743_v39 = vadd.f32 %v2474_v14, %v742_v38 }
  0xcf   : > { %2109 = vmatmul.msk.bf16.gmra.mxu0 %vm669_vm0, %v2229_v37  ;;  %v813_v42 = vmax.f32 %v743_v39, 0.0 }
  0xd4   : > { %v744_v40 = vpop.f32.mrf.mxu0 }
  0xd5   : > { %v745_v41 = vadd.f32 %v2474_v14, %v744_v40 }
  0xd7   : > { %v814_v43 = vmax.f32 %v745_v41, 0.0 }
  0xd9   : > { %v842_v44 = vpack.c.bf16 %v814_v43, %v813_v42 }
  0xdb   : > { %2130 = vmatmul.msk.bf16.gmra.mxu1 %vm669_vm0, %v842_v44  ;;  %v2556_v44 = vld [vmem:[%s2435_s30 + $0x8] sm:$0xff]  }
  0xdc   : > { %v747_v46 = vpop.f32.mrf.mxu0 }
  0xdd   : > { %v748_v47 = vadd.f32 %v2474_v14, %v747_v46  ;;  %v3380_v46 = vunpack.c.l.bf16 %v2556_v44 }
  0xdf   : > { %2110 = vmatmul.msk.bf16.gmra.mxu0 %vm669_vm0, %v2230_v45  ;;  %v815_v50 = vmax.f32 %v748_v47, 0.0 }
  0xe4   : > { %v749_v48 = vpop.f32.mrf.mxu0 }
  0xe5   : > { %v750_v49 = vadd.f32 %v2474_v14, %v749_v48  ;;  %v3379_v48 = vunpack.c.h.bf16 %v2556_v44 }
  0xe7   : > { %v816_v51 = vmax.f32 %v750_v49, 0.0 }
  0xe9   : > { %v843_v52 = vpack.c.bf16 %v816_v51, %v815_v50 }
  0xeb   : > { %2131 = vmatmul.msk.bf16.gmra.mxu1 %vm669_vm0, %v843_v52 }
  0xec   : > { %v752_v54 = vpop.f32.mrf.mxu0 }
  0xed   : > { %v753_v55 = vadd.f32 %v2474_v14, %v752_v54 }
  0xef   : > { %2111 = vmatmul.msk.bf16.gmra.mxu0 %vm669_vm0, %v2231_v53  ;;  %v817_v58 = vmax.f32 %v753_v55, 0.0 }
  0xf4   : > { %v754_v56 = vpop.f32.mrf.mxu0 }
  0xf5   : > { %v755_v57 = vadd.f32 %v2474_v14, %v754_v56 }
  0xf7   : > { %v818_v59 = vmax.f32 %v755_v57, 0.0 }
  0xf9   : > { %v844_v60 = vpack.c.bf16 %v818_v59, %v817_v58 }
  0xfb   : > { %2132 = vmatmul.msk.bf16.gmra.mxu1 %vm669_vm0, %v844_v60 }
  0xfc   : > { %v757_v62 = vpop.f32.mrf.mxu0 }
  0xfd   : > { %v758_v63 = vadd.f32 %v2474_v14, %v757_v62 }
  0xff   : > { %2112 = vmatmul.msk.bf16.gmra.mxu0 %vm669_vm0, %v2232_v61  ;;  %v819_v2 = vmax.f32 %v758_v63, 0.0  ;;  %v2578_v63 = vld [vmem:[%s2435_s30 + $0x10] sm:$0xff]  }
 0x104   : > { %v759_v0 = vpop.f32.mrf.mxu0 }
 0x105   : > { %v760_v1 = vadd.f32 %v2474_v14, %v759_v0 }
 0x107   : > { %v820_v3 = vmax.f32 %v760_v1, 0.0  ;;  %v3376_v1 = vunpack.c.l.bf16 %v2578_v63 }
 0x109   : > { %v845_v4 = vpack.c.bf16 %v820_v3, %v819_v2  ;;  %v3375_v3 = vunpack.c.h.bf16 %v2578_v63 }
 0x10b   : > { %2133 = vmatmul.msk.bf16.gmra.mxu1 %vm669_vm0, %v845_v4 }
 0x10c   : > { %v762_v6 = vpop.f32.mrf.mxu0 }
 0x10d   : > { %v763_v8 = vadd.f32 %v2474_v14, %v762_v6 }
 0x10f   : > { %2113 = vmatmul.msk.bf16.gmra.mxu0 %vm669_vm0, %v2233_v5  ;;  %v821_v12 = vmax.f32 %v763_v8, 0.0 }
 0x114   : > { %v764_v9 = vpop.f32.mrf.mxu0 }
 0x115   : > { %v765_v11 = vadd.f32 %v2474_v14, %v764_v9 }
 0x117   : > { %v822_v13 = vmax.f32 %v765_v11, 0.0 }
 0x119   : > { %v846_v15 = vpack.c.bf16 %v822_v13, %v821_v12 }
 0x11b   : > { %2134 = vmatmul.msk.bf16.gmra.mxu1 %vm669_vm0, %v846_v15 }
 0x11c   : > { %v767_v16 = vpop.f32.mrf.mxu0 }
 0x11d   : > { %v768_v17 = vadd.f32 %v2474_v14, %v767_v16 }
 0x11f   : > { %v823_v20 = vmax.f32 %v768_v17, 0.0 }
 0x124   : > { %v769_v18 = vpop.f32.mrf.mxu0 }
 0x125   : > { %v770_v19 = vadd.f32 %v2474_v14, %v769_v18 }
 0x127   : > { %v824_v21 = vmax.f32 %v770_v19, 0.0  ;;  %v2596_v19 = vld [vmem:[%s2435_s30 + $0x18] sm:$0xff]  }
 0x128   : > { %v934_v22 = vpop.f32.mrf.mxu1 }
 0x129   : > { %v847_v23 = vpack.c.bf16 %v824_v21, %v823_v20  ;;  %v935_v28 = vadd.f32 %v2535_v24, %v934_v22  ;;  %v3374_v21 = vunpack.c.l.bf16 %v2596_v19 }
 0x12b   : > { %2135 = vmatmul.msk.bf16.gmra.mxu1 %vm669_vm0, %v847_v23  ;;  %v1014_v31 = vadd.f32 %v935_v28, %v3382_v27  ;;  %v3373_v23 = vunpack.c.h.bf16 %v2596_v19 }
 0x12c   : > { %v772_v26 = vpop.f32.mrf.mxu0 }
 0x12d   : > { %v773_v33 = vadd.f32 %v2474_v14, %v772_v26  ;;  %v1046_v36 = vmax.f32 %v1014_v31, 0.0 }
 0x12f   : > { %v825_v39 = vmax.f32 %v773_v33, 0.0 }
 0x130   : > { %v936_v30 = vpop.f32.mrf.mxu1 }
 0x131   : > { %v937_v32 = vadd.f32 %v2535_v24, %v936_v30 }
 0x133   : > { %v1015_v34 = vadd.f32 %v937_v32, %v3381_v29 }
 0x134   : > { %v774_v35 = vpop.f32.mrf.mxu0 }
 0x135   : > { %v1047_v37 = vmax.f32 %v1015_v34, 0.0  ;;  %v775_v38 = vadd.f32 %v2474_v14, %v774_v35 }
 0x137   : > { %v826_v40 = vmax.f32 %v775_v38, 0.0  ;;  %v2551_v41 = vpack.c.bf16 %v1047_v37, %v1046_v36 }
 0x138   : > { %v939_v42 = vpop.f32.mrf.mxu1 }
 0x139   : > { %v848_v43 = vpack.c.bf16 %v826_v40, %v825_v39  ;;  %2151 = vmatmul.msk.bf16.vlgmr.msra.gmra.mxu2 %vm669_vm0, %v2551_v41  ;;  %v940_v47 = vadd.f32 %v2535_v24, %v939_v42 }
 0x13b   : > { %2136 = vmatmul.msk.bf16.gmra.mxu1 %vm669_vm0, %v848_v43  ;;  %v1016_v50 = vadd.f32 %v940_v47, %v3380_v46  ;;  %v2614_v43 = vld [vmem:[%s2435_s30 + $0x20] sm:$0xff]  }
 0x13c   : > { %v777_v45 = vpop.f32.mrf.mxu0  ;;  %3416 = vst [vmem:[#allocation4_spill] sm:$0xff] %v2614_v43  ;;  %v3370_v47 = vunpack.c.l.bf16 %v2614_v43 }
 0x13d   : > { %v778_v52 = vadd.f32 %v2474_v14, %v777_v45  ;;  %v1048_v55 = vmax.f32 %v1016_v50, 0.0  ;;  %v3369_v50 = vunpack.c.h.bf16 %v2614_v43 }
 0x13f   : > { %v827_v58 = vmax.f32 %v778_v52, 0.0 }
 0x140   : > { %v941_v49 = vpop.f32.mrf.mxu1 }
 0x141   : > { %v942_v51 = vadd.f32 %v2535_v24, %v941_v49 }
 0x143   : > { %v1017_v53 = vadd.f32 %v942_v51, %v3379_v48 }
 0x144   : > { %v779_v54 = vpop.f32.mrf.mxu0 }
 0x145   : > { %v1049_v56 = vmax.f32 %v1017_v53, 0.0  ;;  %v780_v57 = vadd.f32 %v2474_v14, %v779_v54 }
 0x147   : > { %v828_v59 = vmax.f32 %v780_v57, 0.0  ;;  %v2573_v60 = vpack.c.bf16 %v1049_v56, %v1048_v55 }
 0x148   : > { %v944_v61 = vpop.f32.mrf.mxu1 }
 0x149   : > { %v849_v62 = vpack.c.bf16 %v828_v59, %v827_v58  ;;  %2152 = vmatmul.msk.bf16.gmra.mxu2 %vm669_vm0, %v2573_v60  ;;  %v945_v2 = vadd.f32 %v2535_v24, %v944_v61 }
 0x14b   : > { %2137 = vmatmul.msk.bf16.gmra.mxu1 %vm669_vm0, %v849_v62  ;;  %v1018_v5 = vadd.f32 %v945_v2, %v3376_v1 }
 0x14c   : > { %v782_v0 = vpop.f32.mrf.mxu0 }
 0x14d   : > { %v783_v7 = vadd.f32 %v2474_v14, %v782_v0  ;;  %v1050_v10 = vmax.f32 %v1018_v5, 0.0  ;;  %v2632_v5 = vld [vmem:[%s2435_s30 + $0x28] sm:$0xff]  }
 0x14e   : > { %3417 = vst [vmem:[#allocation5_spill] sm:$0xff] %v2632_v5 }
 0x14f   : > { %v829_v13 = vmax.f32 %v783_v7, 0.0  ;;  %v3368_v7 = vunpack.c.l.bf16 %v2632_v5 }
 0x150   : > { %v946_v4 = vpop.f32.mrf.mxu1 }
 0x151   : > { %v947_v6 = vadd.f32 %v2535_v24, %v946_v4 }
 0x153   : > { %v1019_v8 = vadd.f32 %v947_v6, %v3375_v3 }
 0x154   : > { %v784_v9 = vpop.f32.mrf.mxu0 }
 0x155   : > { %v1051_v11 = vmax.f32 %v1019_v8, 0.0  ;;  %v785_v12 = vadd.f32 %v2474_v14, %v784_v9  ;;  %v3367_v9 = vunpack.c.h.bf16 %v2632_v5 }
 0x157   : > { %v830_v15 = vmax.f32 %v785_v12, 0.0  ;;  %v2591_v16 = vpack.c.bf16 %v1051_v11, %v1050_v10 }
 0x158   : > { %v949_v17 = vpop.f32.mrf.mxu1 }
 0x159   : > { %v850_v18 = vpack.c.bf16 %v830_v15, %v829_v13  ;;  %2153 = vmatmul.msk.bf16.gmra.mxu2 %vm669_vm0, %v2591_v16  ;;  %v950_v22 = vadd.f32 %v2535_v24, %v949_v17 }
 0x15b   : > { %2138 = vmatmul.msk.bf16.gmra.mxu1 %vm669_vm0, %v850_v18  ;;  %v1020_v28 = vadd.f32 %v950_v22, %v3374_v21 }
 0x15c   : > { %v787_v20 = vpop.f32.mrf.mxu0 }
 0x15d   : > { %v788_v31 = vadd.f32 %v2474_v14, %v787_v20  ;;  %v1052_v34 = vmax.f32 %v1020_v28, 0.0 }
 0x15f   : > { %v831_v37 = vmax.f32 %v788_v31, 0.0 }
 0x160   : > { %v951_v26 = vpop.f32.mrf.mxu1 }
 0x161   : > { %v952_v30 = vadd.f32 %v2535_v24, %v951_v26 }
 0x163   : > { %v1021_v32 = vadd.f32 %v952_v30, %v3373_v23 }
 0x164   : > { %v789_v33 = vpop.f32.mrf.mxu0 }
 0x165   : > { %v1053_v35 = vmax.f32 %v1021_v32, 0.0  ;;  %v790_v36 = vadd.f32 %v2474_v14, %v789_v33  ;;  %v2650_v33 = vld [vmem:[%s2435_s30 + $0x30] sm:$0xff]  }
 0x166   : > { %3418 = vst [vmem:[#allocation6_spill] sm:$0xff] %v2650_v33 }
 0x167   : > { %v832_v38 = vmax.f32 %v790_v36, 0.0  ;;  %v2609_v39 = vpack.c.bf16 %v1053_v35, %v1052_v34  ;;  %v3364_v35 = vunpack.c.l.bf16 %v2650_v33 }
 0x168   : > { %v954_v40 = vpop.f32.mrf.mxu1 }
 0x169   : > { %v851_v42 = vpack.c.bf16 %v832_v38, %v831_v37  ;;  %2154 = vmatmul.msk.bf16.gmra.mxu2 %vm669_vm0, %v2609_v39  ;;  %v955_v49 = vadd.f32 %v2535_v24, %v954_v40  ;;  %v3363_v37 = vunpack.c.h.bf16 %v2650_v33 }
 0x16b   : > { %2139 = vmatmul.msk.bf16.gmra.mxu1 %vm669_vm0, %v851_v42  ;;  %v1022_v52 = vadd.f32 %v955_v49, %v3370_v47  ;;  %v2832_v47 = vld [vmem:[%s2435_s30 + $0x78] sm:$0xff]  }
 0x16c   : > { %v792_v45 = vpop.f32.mrf.mxu0  ;;  %3430 = vst [vmem:[#allocation18_spill] sm:$0xff] %v2832_v47 }
 0x16d   : > { %v793_v54 = vadd.f32 %v2474_v14, %v792_v45  ;;  %v1054_v57 = vmax.f32 %v1022_v52, 0.0 }
 0x16f   : > { %v833_v61 = vmax.f32 %v793_v54, 0.0 }
 0x170   : > { %v956_v51 = vpop.f32.mrf.mxu1 }
 0x171   : > { %v957_v53 = vadd.f32 %v2535_v24, %v956_v51 }
 0x173   : > { %v1023_v55 = vadd.f32 %v957_v53, %v3369_v50 }
 0x174   : > { %v794_v56 = vpop.f32.mrf.mxu0 }
 0x175   : > { %v1055_v58 = vmax.f32 %v1023_v55, 0.0  ;;  %v795_v59 = vadd.f32 %v2474_v14, %v794_v56 }
 0x177   : > { %v834_v62 = vmax.f32 %v795_v59, 0.0  ;;  %v2627_v0 = vpack.c.bf16 %v1055_v58, %v1054_v57 }
 0x178   : > { %v959_v2 = vpop.f32.mrf.mxu1 }
 0x179   : > { %v852_v4 = vpack.c.bf16 %v834_v62, %v833_v61  ;;  %2155 = vmatmul.msk.bf16.gmra.mxu2 %vm669_vm0, %v2627_v0  ;;  %v960_v8 = vadd.f32 %v2535_v24, %v959_v2  ;;  %v2668_v61 = vld [vmem:[%s2435_s30 + $0x38] sm:$0xff]  }
 0x17a   : > { %3419 = vst [vmem:[#allocation7_spill] sm:$0xff] %v2668_v61  ;;  %v3362_v62 = vunpack.c.l.bf16 %v2668_v61 }
 0x17b   : > { %2140 = vmatmul.msk.bf16.gmra.mxu1 %vm669_vm0, %v852_v4  ;;  %v1024_v11 = vadd.f32 %v960_v8, %v3368_v7 }
 0x17c   : > { %v797_v6 = vpop.f32.mrf.mxu0 }
 0x17d   : > { %v798_v13 = vadd.f32 %v2474_v14, %v797_v6  ;;  %v1056_v18 = vmax.f32 %v1024_v11, 0.0 }
 0x17f   : > { %v835_v26 = vmax.f32 %v798_v13, 0.0 }
 0x180   : > { %v961_v10 = vpop.f32.mrf.mxu1 }
 0x181   : > { %v962_v12 = vadd.f32 %v2535_v24, %v961_v10 }
 0x183   : > { %v1025_v15 = vadd.f32 %v962_v12, %v3367_v9 }
 0x184   : > { %v799_v17 = vpop.f32.mrf.mxu0 }
 0x185   : > { %v1057_v20 = vmax.f32 %v1025_v15, 0.0  ;;  %v800_v22 = vadd.f32 %v2474_v14, %v799_v17  ;;  %v2684_v17 = vld [vmem:[%s2435_s30 + $0x40] sm:$0xff]  }
 0x186   : > { %3420 = vst [vmem:[#allocation8_spill] sm:$0xff] %v2684_v17 }
 0x187   : > { %v836_v28 = vmax.f32 %v800_v22, 0.0  ;;  %v2645_v30 = vpack.c.bf16 %v1057_v20, %v1056_v18  ;;  %v3358_v18 = vunpack.c.l.bf16 %v2684_v17  ;;  %v3357_v22 = vunpack.c.h.bf16 %v2684_v17 }
 0x188   : > { %v964_v31 = vpop.f32.mrf.mxu1 }
 0x189   : > { %v853_v32 = vpack.c.bf16 %v836_v28, %v835_v26  ;;  %2156 = vmatmul.msk.bf16.gmra.mxu2 %vm669_vm0, %v2645_v30  ;;  %v965_v36 = vadd.f32 %v2535_v24, %v964_v31 }
 0x18b   : > { %2141 = vmatmul.msk.bf16.gmra.mxu1 %vm669_vm0, %v853_v32  ;;  %v1026_v40 = vadd.f32 %v965_v36, %v3364_v35  ;;  %v2811_v35 = vld [vmem:[%s2435_s30 + $0x70] sm:$0xff]  }
 0x18c   : > { %v802_v34 = vpop.f32.mrf.mxu0  ;;  %3428 = vst [vmem:[#allocation16_spill] sm:$0xff] %v2811_v35 }
 0x18d   : > { %v803_v45 = vadd.f32 %v2474_v14, %v802_v34  ;;  %v1058_v52 = vmax.f32 %v1026_v40, 0.0 }
 0x18f   : > { %v837_v55 = vmax.f32 %v803_v45, 0.0  ;;  %v2706_v45 = vld [vmem:[%s2435_s30 + $0x48] sm:$0xff]  }
 0x190   : > { %v966_v38 = vpop.f32.mrf.mxu1  ;;  %3421 = vst [vmem:[#allocation9_spill] sm:$0xff] %v2706_v45 }
 0x191   : > { %v967_v42 = vadd.f32 %v2535_v24, %v966_v38 }
 0x193   : > { %v1027_v49 = vadd.f32 %v967_v42, %v3363_v37  ;;  %v2703_v42 = vld [vmem:[%s479_s12] ss:$0 sm:$0xff] }
 0x194   : > { %v804_v51 = vpop.f32.mrf.mxu0 }
 0x195   : > { %v1059_v53 = vmax.f32 %v1027_v49, 0.0  ;;  %v805_v54 = vadd.f32 %v2474_v14, %v804_v51  ;;  %v3361_v14 = vunpack.c.h.bf16 %v2668_v61  ;;  %v3356_v51 = vunpack.c.l.bf16 %v2706_v45 }
 0x197   : > { %v838_v56 = vmax.f32 %v805_v54, 0.0  ;;  %v2663_v57 = vpack.c.bf16 %v1059_v53, %v1058_v52  ;;  %v3355_v54 = vunpack.c.h.bf16 %v2706_v45 }
 0x198   : > { %v969_v58 = vpop.f32.mrf.mxu1 }
 0x199   : > { %v854_v59 = vpack.c.bf16 %v838_v56, %v837_v55  ;;  %2157 = vmatmul.msk.bf16.gmra.mxu2 %vm669_vm0, %v2663_v57  ;;  %v970_v2 = vadd.f32 %v2535_v24, %v969_v58 }
 0x19b   : > { %2142 = vmatmul.msk.bf16.gmra.mxu1 %vm669_vm0, %v854_v59  ;;  %v1028_v6 = vadd.f32 %v970_v2, %v3362_v62 }
 0x19d   : > { %v1060_v11 = vmax.f32 %v1028_v6, 0.0 }
 0x1a0   : > { %v971_v4 = vpop.f32.mrf.mxu1 }
 0x1a1   : > { %v972_v8 = vadd.f32 %v2535_v24, %v971_v4 }
 0x1a3   : > { %v1029_v10 = vadd.f32 %v972_v8, %v3361_v14 }
 0x1a5   : > { %v1061_v12 = vmax.f32 %v1029_v10, 0.0 }
 0x1a7   : > { %v2679_v13 = vpack.c.bf16 %v1061_v12, %v1060_v11  ;;  %v2727_v12 = vld [vmem:[%s2435_s30 + $0x50] sm:$0xff]  }
 0x1a8   : > { %v974_v15 = vpop.f32.mrf.mxu1  ;;  %3422 = vst [vmem:[#allocation10_spill] sm:$0xff] %v2727_v12 }
 0x1a9   : > { %2158 = vmatmul.msk.bf16.gmra.mxu2 %vm669_vm0, %v2679_v13  ;;  %v975_v20 = vadd.f32 %v2535_v24, %v974_v15 }
 0x1ab   : > { %v1030_v28 = vadd.f32 %v975_v20, %v3358_v18  ;;  %v3352_v20 = vunpack.c.l.bf16 %v2727_v12  ;;  %v2790_v18 = vld [vmem:[%s2435_s30 + $0x68] sm:$0xff]  }
 0x1ac   : > { %3426 = vst [vmem:[#allocation14_spill] sm:$0xff] %v2790_v18 }
 0x1ad   : > { %v1062_v34 = vmax.f32 %v1030_v28, 0.0 }
 0x1b0   : > { %v976_v26 = vpop.f32.mrf.mxu1 }
 0x1b1   : > { %v977_v31 = vadd.f32 %v2535_v24, %v976_v26 }
 0x1b3   : > { %v1031_v32 = vadd.f32 %v977_v31, %v3357_v22  ;;  %v3351_v31 = vunpack.c.h.bf16 %v2727_v12 }
 0x1b5   : > { %v1063_v36 = vmax.f32 %v1031_v32, 0.0 }
 0x1b7   : > { %v2694_v38 = vpack.c.bf16 %v1063_v36, %v1062_v34 }
 0x1b8   : > { %v979_v40 = vpop.f32.mrf.mxu1 }
 0x1b9   : > { %2159 = vmatmul.msk.bf16.gmra.mxu2 %vm669_vm0, %v2694_v38  ;;  %v980_v52 = vadd.f32 %v2535_v24, %v979_v40 }
 0x1bb   : > { %v1032_v56 = vadd.f32 %v980_v52, %v3356_v51 }
 0x1bc   : > { %v1171_v49 = vpop.f32.mrf.mxu2 }
 0x1bd   : > { %v2711_v53 = vadd.f32 %v2703_v42, %v1171_v49  ;;  %v1064_v4 = vmax.f32 %v1032_v56, 0.0 }
 0x1c0   : > { %v981_v55 = vpop.f32.mrf.mxu1 }
 0x1c1   : > { %v982_v58 = vadd.f32 %v2535_v24, %v981_v55 }
 0x1c3   : > { %v1033_v59 = vadd.f32 %v982_v58, %v3355_v54 }
 0x1c4   : > { %v1173_v2 = vpop.f32.mrf.mxu2 }
 0x1c5   : > { %v1065_v6 = vmax.f32 %v1033_v59, 0.0  ;;  %v2720_v8 = vadd.f32 %v2703_v42, %v1173_v2  ;;  %v2748_v2 = vld [vmem:[%s2435_s30 + $0x58] sm:$0xff]  }
 0x1c6   : > { %3423 = vst [vmem:[#allocation11_spill] sm:$0xff] %v2748_v2 }
 0x1c7   : > { %v2722_v10 = vpack.c.bf16 %v1065_v6, %v1064_v4  ;;  %v3354_v6 = vunpack.c.l.bf16 %v2748_v2 }
 0x1c8   : > { %v984_v11 = vpop.f32.mrf.mxu1 }
 0x1c9   : > { %2160 = vmatmul.msk.bf16.gmra.mxu2 %vm669_vm0, %v2722_v10  ;;  %v985_v26 = vadd.f32 %v2535_v24, %v984_v11 }
 0x1cb   : > { %v1034_v34 = vadd.f32 %v985_v26, %v3352_v20  ;;  %v3353_v26 = vunpack.c.h.bf16 %v2748_v2  ;;  %v2769_v20 = vld [vmem:[%s2435_s30 + $0x60] sm:$0xff]  }
 0x1cc   : > { %v1176_v15 = vpop.f32.mrf.mxu2  ;;  %3424 = vst [vmem:[#allocation12_spill] sm:$0xff] %v2769_v20 }
 0x1cd   : > { %v2732_v28 = vadd.f32 %v2703_v42, %v1176_v15  ;;  %v1066_v52 = vmax.f32 %v1034_v34, 0.0 }
 0x1d0   : > { %v986_v32 = vpop.f32.mrf.mxu1 }
 0x1d1   : > { %v987_v36 = vadd.f32 %v2535_v24, %v986_v32 }
 0x1d3   : > { %v1035_v40 = vadd.f32 %v987_v36, %v3351_v31 }
 0x1d4   : > { %v1178_v49 = vpop.f32.mrf.mxu2 }
 0x1d5   : > { %v1067_v55 = vmax.f32 %v1035_v40, 0.0  ;;  %v2741_v56 = vadd.f32 %v2703_v42, %v1178_v49 }
 0x1d7   : > { %v2743_v58 = vpack.c.bf16 %v1067_v55, %v1066_v52 }
 0x1d8   : > { %v989_v59 = vpop.f32.mrf.mxu1 }
 0x1d9   : > { %2161 = vmatmul.msk.bf16.gmra.mxu2 %vm669_vm0, %v2743_v58  ;;  %v990_v11 = vadd.f32 %v2535_v24, %v989_v59 }
 0x1db   : > { %v1036_v34 = vadd.f32 %v990_v11, %v3354_v6 }
 0x1dc   : > { %v1181_v4 = vpop.f32.mrf.mxu2 }
 0x1dd   : > { %v2753_v15 = vadd.f32 %v2703_v42, %v1181_v4  ;;  %v1068_v52 = vmax.f32 %v1036_v34, 0.0 }
 0x1e0   : > { %v991_v32 = vpop.f32.mrf.mxu1 }
 0x1e1   : > { %v992_v36 = vadd.f32 %v2535_v24, %v991_v32  ;;  %v3360_v32 = vunpack.c.l.bf16 %v2769_v20 }
 0x1e3   : > { %v1037_v40 = vadd.f32 %v992_v36, %v3353_v26 }
 0x1e4   : > { %v1183_v49 = vpop.f32.mrf.mxu2 }
 0x1e5   : > { %v1069_v55 = vmax.f32 %v1037_v40, 0.0  ;;  %v2762_v31 = vadd.f32 %v2703_v42, %v1183_v49  ;;  %v3359_v40 = vunpack.c.h.bf16 %v2769_v20 }
 0x1e7   : > { %v2764_v59 = vpack.c.bf16 %v1069_v55, %v1068_v52 }
 0x1e8   : > { %v994_v4 = vpop.f32.mrf.mxu1 }
 0x1e9   : > { %2162 = vmatmul.msk.bf16.gmra.mxu2 %vm669_vm0, %v2764_v59  ;;  %v995_v36 = vadd.f32 %v2535_v24, %v994_v4 }
 0x1eb   : > { %v1038_v52 = vadd.f32 %v995_v36, %v3360_v32 }
 0x1ec   : > { %v1186_v11 = vpop.f32.mrf.mxu2 }
 0x1ed   : > { %v2774_v34 = vadd.f32 %v2703_v42, %v1186_v11  ;;  %v1070_v54 = vmax.f32 %v1038_v52, 0.0 }
 0x1f0   : > { %v996_v49 = vpop.f32.mrf.mxu1 }
 0x1f1   : > { %v997_v55 = vadd.f32 %v2535_v24, %v996_v49  ;;  %v3366_v49 = vunpack.c.l.bf16 %v2790_v18 }
 0x1f3   : > { %v1039_v26 = vadd.f32 %v997_v55, %v3359_v40 }
 0x1f4   : > { %v1188_v6 = vpop.f32.mrf.mxu2 }
 0x1f5   : > { %v1071_v51 = vmax.f32 %v1039_v26, 0.0  ;;  %v2783_v22 = vadd.f32 %v2703_v42, %v1188_v6  ;;  %v3365_v6 = vunpack.c.h.bf16 %v2790_v18 }
 0x1f7   : > { %v2785_v4 = vpack.c.bf16 %v1071_v51, %v1070_v54 }
 0x1f8   : > { %v999_v11 = vpop.f32.mrf.mxu1 }
 0x1f9   : > { %3425 = vst [vmem:[#allocation13_spill] sm:$0xff] %v2785_v4  ;;  %2163 = vmatmul.msk.bf16.gmra.mxu2 %vm669_vm0, %v2785_v4  ;;  %v1000_v55 = vadd.f32 %v2535_v24, %v999_v11 }
 0x1fb   : > { %v1040_v51 = vadd.f32 %v1000_v55, %v3366_v49 }
 0x1fc   : > { %v1191_v36 = vpop.f32.mrf.mxu2 }
 0x1fd   : > { %v2795_v52 = vadd.f32 %v2703_v42, %v1191_v36  ;;  %v1072_v14 = vmax.f32 %v1040_v51, 0.0 }
 0x200   : > { %v1001_v26 = vpop.f32.mrf.mxu1 }
 0x201   : > { %v1002_v54 = vadd.f32 %v2535_v24, %v1001_v26  ;;  %v3371_v26 = vunpack.c.l.bf16 %v2811_v35 }
 0x203   : > { %v1041_v40 = vadd.f32 %v1002_v54, %v3365_v6 }
 0x204   : > { %v1193_v32 = vpop.f32.mrf.mxu2 }
 0x205   : > { %v1073_v62 = vmax.f32 %v1041_v40, 0.0  ;;  %v2804_v37 = vadd.f32 %v2703_v42, %v1193_v32  ;;  %v3372_v32 = vunpack.c.h.bf16 %v2811_v35 }
 0x207   : > { %v2806_v11 = vpack.c.bf16 %v1073_v62, %v1072_v14 }
 0x208   : > { %v1004_v36 = vpop.f32.mrf.mxu1 }
 0x209   : > { %3427 = vst [vmem:[#allocation15_spill] sm:$0xff] %v2806_v11  ;;  %2164 = vmatmul.msk.bf16.gmra.mxu2 %vm669_vm0, %v2806_v11  ;;  %v1005_v54 = vadd.f32 %v2535_v24, %v1004_v36 }
 0x20b   : > { %v1042_v62 = vadd.f32 %v1005_v54, %v3371_v26 }
 0x20c   : > { %v1196_v55 = vpop.f32.mrf.mxu2 }
 0x20d   : > { %v2816_v51 = vadd.f32 %v2703_v42, %v1196_v55  ;;  %v1074_v9 = vmax.f32 %v1042_v62, 0.0 }
 0x210   : > { %v1006_v40 = vpop.f32.mrf.mxu1 }
 0x211   : > { %v1007_v14 = vadd.f32 %v2535_v24, %v1006_v40  ;;  %v3378_v40 = vunpack.c.l.bf16 %v2832_v47 }
 0x213   : > { %v1043_v6 = vadd.f32 %v1007_v14, %v3372_v32 }
 0x214   : > { %v1198_v49 = vpop.f32.mrf.mxu2 }
 0x215   : > { %v1075_v7 = vmax.f32 %v1043_v6, 0.0  ;;  %v2825_v50 = vadd.f32 %v2703_v42, %v1198_v49  ;;  %v3377_v6 = vunpack.c.h.bf16 %v2832_v47 }
 0x217   : > { %v2827_v36 = vpack.c.bf16 %v1075_v7, %v1074_v9 }
 0x218   : > { %v1009_v55 = vpop.f32.mrf.mxu1 }
 0x219   : > { %3429 = vst [vmem:[#allocation17_spill] sm:$0xff] %v2827_v36  ;;  %2165 = vmatmul.msk.bf16.gmra.mxu2 %vm669_vm0, %v2827_v36  ;;  %v1010_v26 = vadd.f32 %v2535_v24, %v1009_v55 }
 0x21b   : > { %v1044_v7 = vadd.f32 %v1010_v26, %v3378_v40 }
 0x21c   : > { %v1201_v54 = vpop.f32.mrf.mxu2 }
 0x21d   : > { %v2837_v14 = vadd.f32 %v2703_v42, %v1201_v54  ;;  %v1076_v23 = vmax.f32 %v1044_v7, 0.0 }
 0x220   : > { %v1011_v49 = vpop.f32.mrf.mxu1 }
 0x221   : > { %v1012_v9 = vadd.f32 %v2535_v24, %v1011_v49 }
 0x223   : > { %v1045_v62 = vadd.f32 %v1012_v9, %v3377_v6 }
 0x224   : > { %v1203_v32 = vpop.f32.mrf.mxu2 }
 0x225   : > { %v1077_v21 = vmax.f32 %v1045_v62, 0.0  ;;  %v2846_v3 = vadd.f32 %v2703_v42, %v1203_v32 }
 0x227   : > { %v2848_v55 = vpack.c.bf16 %v1077_v21, %v1076_v23 }
 0x229   : > { %3431 = vst [vmem:[#allocation19_spill] sm:$0xff] %v2848_v55  ;;  %2166 = vmatmul.msk.bf16.gmra.mxu2 %vm669_vm0, %v2848_v55 }
 0x22c   : > { %v1206_v54 = vpop.f32.mrf.mxu2 }
 0x22d   : > { %v2853_v1 = vadd.f32 %v2703_v42, %v1206_v54 }
 0x234   : > { %v1208_v26 = vpop.f32.mrf.mxu2 }
 0x235   : > { %v2856_v24 = vadd.f32 %v2703_v42, %v1208_v26 }
 0x23c   : > { %v1211_v49 = vpop.f32.mrf.mxu2 }
 0x23d   : > { %v2859_v7 = vadd.f32 %v2703_v42, %v1211_v49 }
 0x244   : > { %v1213_v9 = vpop.f32.mrf.mxu2 }
 0x245   : > { %v2862_v32 = vadd.f32 %v2703_v42, %v1213_v9 }
 0x24c   : > { %v1216_v21 = vpop.f32.mrf.mxu2 }
 0x24d   : > { %v2865_v23 = vadd.f32 %v2703_v42, %v1216_v21 }
 0x254   : > { %v1218_v62 = vpop.f32.mrf.mxu2 }
 0x255   : > { %v2868_v54 = vadd.f32 %v2703_v42, %v1218_v62 }
 0x25c   : > { %v1221_v6 = vpop.f32.mrf.mxu2 }
 0x25d   : > { %v2871_v26 = vadd.f32 %v2703_v42, %v1221_v6 }
 0x264   : > { %v1223_v40 = vpop.f32.mrf.mxu2 }
 0x265   : > { %v2874_v49 = vadd.f32 %v2703_v42, %v1223_v40 }
 0x26c   : > { %v1226_v48 = vpop.f32.mrf.mxu2 }
 0x26d   : > { %v2877_v9 = vadd.f32 %v2703_v42, %v1226_v48 }
 0x274   : > { %v1228_v46 = vpop.f32.mrf.mxu2 }
 0x275   : > { %v2880_v21 = vadd.f32 %v2703_v42, %v1228_v46 }
 0x27c   : > { %v1231_v29 = vpop.f32.mrf.mxu2 }
 0x27d   : > { %v2883_v62 = vadd.f32 %v2703_v42, %v1231_v29 }
 0x284   : > { %v1233_v27 = vpop.f32.mrf.mxu2 }
 0x285   : > { %v2886_v6 = vadd.f32 %v2703_v42, %v1233_v27 }
 0x28c   : > { %v1236_v47 = vpop.f32.mrf.mxu2 }
 0x28d   : > { %v2889_v40 = vadd.f32 %v2703_v42, %v1236_v47 }
 0x294   : > { %v1238_v35 = vpop.f32.mrf.mxu2 }
 0x295   : > { %v2892_v48 = vadd.f32 %v2703_v42, %v1238_v35 }
 0x29c   : > { %v1241_v18 = vpop.f32.mrf.mxu2 }
 0x29d   : > { %v2895_v46 = vadd.f32 %v2703_v42, %v1241_v18 }
 0x2a4   : > { %v1243_v20 = vpop.f32.mrf.mxu2 }
 0x2a5   : > { %v2898_v29 = vadd.f32 %v2703_v42, %v1243_v20 }
 0x2ac   : > { %v1246_v2 = vpop.f32.mrf.mxu2 }
 0x2ad   : > { %v2901_v27 = vadd.f32 %v2703_v42, %v1246_v2 }
 0x2b1   : > { %1254 = sbr.rel (%p2167_p7) target bundleno = 727 (0x2d7), region = 60 }
 0x2b4   : > { %v1248_v12 = vpop.f32.mrf.mxu2 }
 0x2b5   : > { %v2904_v47 = vadd.f32 %v2703_v42, %v1248_v12 }
 0x2b6   : > { %vm1255_vm1 = vcmask 130048   ;;  %v2332_v35 = vmov 0.0  }
 0x2b7   : > { %1256 = vst.msk [vmem:[#allocation2] sm:$0xff] %vm1255_vm1, %v2332_v35 }
 0x2b8   : > { %1257 = vst.msk [vmem:[#allocation2 + $0x8] sm:$0xff] %vm1255_vm1, %v2332_v35 }
 0x2b9   : > { %1258 = vst.msk [vmem:[#allocation2 + $0x10] sm:$0xff] %vm1255_vm1, %v2332_v35 }
 0x2ba   : > { %1259 = vst.msk [vmem:[#allocation2 + $0x18] sm:$0xff] %vm1255_vm1, %v2332_v35 }
 0x2bb   : > { %1260 = vst.msk [vmem:[#allocation2 + $0x20] sm:$0xff] %vm1255_vm1, %v2332_v35 }
 0x2bc   : > { %1261 = vst.msk [vmem:[#allocation2 + $0x28] sm:$0xff] %vm1255_vm1, %v2332_v35 }
 0x2bd   : > { %1262 = vst.msk [vmem:[#allocation2 + $0x30] sm:$0xff] %vm1255_vm1, %v2332_v35 }
 0x2be   : > { %1263 = vst.msk [vmem:[#allocation2 + $0x38] sm:$0xff] %vm1255_vm1, %v2332_v35 }
 0x2bf   : > { %1264 = vst.msk [vmem:[#allocation2 + $0x40] sm:$0xff] %vm1255_vm1, %v2332_v35 }
 0x2c0   : > { %1265 = vst.msk [vmem:[#allocation2 + $0x48] sm:$0xff] %vm1255_vm1, %v2332_v35 }
 0x2c1   : > { %1266 = vst.msk [vmem:[#allocation2 + $0x50] sm:$0xff] %vm1255_vm1, %v2332_v35 }
 0x2c2   : > { %1267 = vst.msk [vmem:[#allocation2 + $0x58] sm:$0xff] %vm1255_vm1, %v2332_v35 }
 0x2c3   : > { %1268 = vst.msk [vmem:[#allocation2 + $0x60] sm:$0xff] %vm1255_vm1, %v2332_v35 }
 0x2c4   : > { %1269 = vst.msk [vmem:[#allocation2 + $0x68] sm:$0xff] %vm1255_vm1, %v2332_v35 }
 0x2c5   : > { %1270 = vst.msk [vmem:[#allocation2 + $0x70] sm:$0xff] %vm1255_vm1, %v2332_v35 }
 0x2c6   : > { %1271 = vst.msk [vmem:[#allocation2 + $0x78] sm:$0xff] %vm1255_vm1, %v2332_v35 }
 0x2c7   : > { %1272 = vst.msk [vmem:[#allocation2 + $0x80] sm:$0xff] %vm1255_vm1, %v2332_v35 }
 0x2c8   : > { %1273 = vst.msk [vmem:[#allocation2 + $0x88] sm:$0xff] %vm1255_vm1, %v2332_v35 }
 0x2c9   : > { %1274 = vst.msk [vmem:[#allocation2 + $0x90] sm:$0xff] %vm1255_vm1, %v2332_v35 }
 0x2ca   : > { %1275 = vst.msk [vmem:[#allocation2 + $0x98] sm:$0xff] %vm1255_vm1, %v2332_v35 }
 0x2cb   : > { %1276 = vst.msk [vmem:[#allocation2 + $0xa0] sm:$0xff] %vm1255_vm1, %v2332_v35 }
 0x2cc   : > { %1277 = vst.msk [vmem:[#allocation2 + $0xa8] sm:$0xff] %vm1255_vm1, %v2332_v35 }
 0x2cd   : > { %1278 = vst.msk [vmem:[#allocation2 + $0xb0] sm:$0xff] %vm1255_vm1, %v2332_v35 }
 0x2ce   : > { %1279 = vst.msk [vmem:[#allocation2 + $0xb8] sm:$0xff] %vm1255_vm1, %v2332_v35 }
 0x2cf   : > { %1280 = vst.msk [vmem:[#allocation2 + $0xc0] sm:$0xff] %vm1255_vm1, %v2332_v35 }
 0x2d0   : > { %1281 = vst.msk [vmem:[#allocation2 + $0xc8] sm:$0xff] %vm1255_vm1, %v2332_v35 }
 0x2d1   : > { %1282 = vst.msk [vmem:[#allocation2 + $0xd0] sm:$0xff] %vm1255_vm1, %v2332_v35 }
 0x2d2   : > { %1283 = vst.msk [vmem:[#allocation2 + $0xd8] sm:$0xff] %vm1255_vm1, %v2332_v35 }
 0x2d3   : > { %1284 = vst.msk [vmem:[#allocation2 + $0xe0] sm:$0xff] %vm1255_vm1, %v2332_v35 }
 0x2d4   : > { %1285 = vst.msk [vmem:[#allocation2 + $0xe8] sm:$0xff] %vm1255_vm1, %v2332_v35 }
 0x2d5   : > { %1286 = vst.msk [vmem:[#allocation2 + $0xf0] sm:$0xff] %vm1255_vm1, %v2332_v35 }
 0x2d6   : > { %1287 = vst.msk [vmem:[#allocation2 + $0xf8] sm:$0xff] %vm1255_vm1, %v2332_v35 }
 0x2d7 PF: > { %v1288_v18 = vld [vmem:[#allocation2] sm:$0xff]  ;;  %v1289_v42 = vld [vmem:[#allocation2 + $0x8] sm:$0xff]  ;;  %v1290_v12 = vld [vmem:[#allocation2 + $0x10] sm:$0xff]  ;;  %vm1352_vm2 = vcmask 130048   ;;  %p2192_p8 = scmp.ne.s32.totalorder %s2314_s13, 1 }
 0x2d8   : > { %v1291_v20 = vld [vmem:[#allocation2 + $0x18] sm:$0xff]  ;;  %v1292_v2 = vld [vmem:[#allocation2 + $0x20] sm:$0xff]  ;;  %v1293_v45 = vld [vmem:[#allocation2 + $0x28] sm:$0xff]  ;;  %v1320_v17 = vadd.f32 %v1288_v18, %v2711_v53  ;;  %v1321_v61 = vadd.f32 %v1289_v42, %v2720_v8  ;;  %v1322_v55 = vadd.f32 %v1290_v12, %v2732_v28 }
 0x2d9   : > { %v1294_v33 = vld [vmem:[#allocation2 + $0x30] sm:$0xff]  ;;  %v1323_v36 = vadd.f32 %v1291_v20, %v2741_v56  ;;  %v1295_v5 = vld [vmem:[#allocation2 + $0x38] sm:$0xff]  ;;  %v1324_v35 = vadd.f32 %v1292_v2, %v2753_v15  ;;  %v1296_v11 = vld [vmem:[#allocation2 + $0x40] sm:$0xff]  ;;  %v1325_v43 = vadd.f32 %v1293_v45, %v2762_v31 }
 0x2da   : > { %1353 = vst.msk [vmem:[#allocation2] sm:$0xff] %vm1352_vm2, %v1320_v17  ;;  %v1297_v4 = vld [vmem:[#allocation2 + $0x48] sm:$0xff]  ;;  %v1326_v53 = vadd.f32 %v1294_v33, %v2774_v34  ;;  %v1298_v8 = vld [vmem:[#allocation2 + $0x50] sm:$0xff]  ;;  %v1327_v28 = vadd.f32 %v1295_v5, %v2783_v22  ;;  %v1299_v56 = vld [vmem:[#allocation2 + $0x58] sm:$0xff]  ;;  %v1328_v15 = vadd.f32 %v1296_v11, %v2795_v52 }
 0x2db   : > { %1354 = vst.msk [vmem:[#allocation2 + $0x8] sm:$0xff] %vm1352_vm2, %v1321_v61  ;;  %v1300_v17 = vld [vmem:[#allocation2 + $0x60] sm:$0xff]  ;;  %v1329_v45 = vadd.f32 %v1297_v4, %v2804_v37  ;;  %v1301_v33 = vld [vmem:[#allocation2 + $0x68] sm:$0xff]  ;;  %v1330_v61 = vadd.f32 %v1298_v8, %v2816_v51  ;;  %v1302_v31 = vld [vmem:[#allocation2 + $0x70] sm:$0xff]  ;;  %v1331_v5 = vadd.f32 %v1299_v56, %v2825_v50 }
 0x2dc   : > { %1355 = vst.msk [vmem:[#allocation2 + $0x10] sm:$0xff] %vm1352_vm2, %v1322_v55  ;;  %v2241_v22 = vld [vmem:[%s2490_s23 + $0x8] sm:$0xff]  ;;  %v1303_v34 = vld [vmem:[#allocation2 + $0x78] sm:$0xff]  ;;  %v1332_v52 = vadd.f32 %v1300_v17, %v2837_v14  ;;  %v1304_v37 = vld [vmem:[#allocation2 + $0x80] sm:$0xff]  ;;  %v1333_v4 = vadd.f32 %v1301_v33, %v2846_v3  ;;  %v1334_v51 = vadd.f32 %v1302_v31, %v2853_v1  ;;  %v3436_v31 = vunpack.c.l.bf16 %v2578_v63 }
 0x2dd   : > { %1356 = vst.msk [vmem:[#allocation2 + $0x18] sm:$0xff] %vm1352_vm2, %v1323_v36  ;;  %1407 = vmatpush.bf16.msra.mxu3 %v2241_v22  ;;  %v1305_v11 = vld [vmem:[#allocation2 + $0x88] sm:$0xff]  ;;  %v1306_v50 = vld [vmem:[#allocation2 + $0x90] sm:$0xff]  ;;  %v1335_v36 = vadd.f32 %v1303_v34, %v2856_v24  ;;  %v1307_v14 = vld [vmem:[#allocation2 + $0x98] sm:$0xff]  ;;  %v1336_v55 = vadd.f32 %v1304_v37, %v2859_v7 }
 0x2de   : > { %1357 = vst.msk [vmem:[#allocation2 + $0x20] sm:$0xff] %vm1352_vm2, %v1324_v35  ;;  %v1308_v3 = vld [vmem:[#allocation2 + $0xa0] sm:$0xff]  ;;  %v1337_v18 = vadd.f32 %v1305_v11, %v2862_v32  ;;  %v1309_v42 = vld [vmem:[#allocation2 + $0xa8] sm:$0xff]  ;;  %v1338_v1 = vadd.f32 %v1306_v50, %v2865_v23  ;;  %v1310_v12 = vld [vmem:[#allocation2 + $0xb0] sm:$0xff]  ;;  %v1339_v24 = vadd.f32 %v1307_v14, %v2868_v54 }
 0x2df   : > { %1358 = vst.msk [vmem:[#allocation2 + $0x28] sm:$0xff] %vm1352_vm2, %v1325_v43  ;;  %v2240_v43 = vld [vmem:[%s2490_s23] sm:$0xff]  ;;  %v1311_v20 = vld [vmem:[#allocation2 + $0xb8] sm:$0xff]  ;;  %v1340_v7 = vadd.f32 %v1308_v3, %v2871_v26  ;;  %v1341_v2 = vadd.f32 %v1309_v42, %v2874_v49  ;;  %v1313_v23 = vld [vmem:[#allocation2 + $0xc8] sm:$0xff]  ;;  %v1342_v35 = vadd.f32 %v1310_v12, %v2877_v9 }
 0x2e0   : > { %1359 = vst.msk [vmem:[#allocation2 + $0x30] sm:$0xff] %vm1352_vm2, %v1326_v53  ;;  %v1312_v32 = vld [vmem:[#allocation2 + $0xc0] sm:$0xff]  ;;  %v1314_v54 = vld [vmem:[#allocation2 + $0xd0] sm:$0xff]  ;;  %v1343_v53 = vadd.f32 %v1311_v20, %v2880_v21  ;;  %v1315_v26 = vld [vmem:[#allocation2 + $0xd8] sm:$0xff]  ;;  %v1345_v49 = vadd.f32 %v1313_v23, %v2886_v6 }
 0x2e1   : > { %1360 = vst.msk [vmem:[#allocation2 + $0x38] sm:$0xff] %vm1352_vm2, %v1327_v28  ;;  %1408 = vmatpush.bf16.msra.mxu3 %v2240_v43  ;;  %v1344_v8 = vadd.f32 %v1312_v32, %v2883_v62  ;;  %v1317_v28 = vld [vmem:[#allocation2 + $0xe8] sm:$0xff]  ;;  %v1346_v9 = vadd.f32 %v1314_v54, %v2889_v40  ;;  %v1318_v56 = vld [vmem:[#allocation2 + $0xf0] sm:$0xff]  ;;  %v1347_v21 = vadd.f32 %v1315_v26, %v2892_v48  ;;  %v3444_v20 = vld [vmem:[#allocation15_spill] sm:$0xff] }
 0x2e2   : > { %1361 = vst.msk [vmem:[#allocation2 + $0x40] sm:$0xff] %vm1352_vm2, %v1328_v15  ;;  %v1319_v15 = vld [vmem:[#allocation2 + $0xf8] sm:$0xff]  ;;  %v1349_v17 = vadd.f32 %v1317_v28, %v2898_v29  ;;  %v1350_v6 = vadd.f32 %v1318_v56, %v2901_v27  ;;  %v3434_v29 = vunpack.c.l.bf16 %v2556_v44  ;;  %v3440_v14 = vld [vmem:[#allocation13_spill] sm:$0xff]  ;;  %v3449_v28 = vld [vmem:[#allocation6_spill] sm:$0xff] }
 0x2e3   : > { %1362 = vst.msk [vmem:[#allocation2 + $0x48] sm:$0xff] %vm1352_vm2, %v1329_v45  ;;  %v1351_v40 = vadd.f32 %v1319_v15, %v2904_v47  ;;  %v3445_v32 = vld [vmem:[#allocation5_spill] sm:$0xff] }
 0x2e4   : > { %1363 = vst.msk [vmem:[#allocation2 + $0x50] sm:$0xff] %vm1352_vm2, %v1330_v61  ;;  %2176 = vmatmul.msk.bf16.vlgmr.msra.gmra.mxu3 %vm669_vm0, %v2551_v41  ;;  %v1316_v41 = vld [vmem:[#allocation2 + $0xe0] sm:$0xff] }
 0x2e5   : > { %1364 = vst.msk [vmem:[#allocation2 + $0x58] sm:$0xff] %vm1352_vm2, %v1331_v5  ;;  %v1348_v62 = vadd.f32 %v1316_v41, %v2895_v46  ;;  %v3448_v41 = vld [vmem:[#allocation17_spill] sm:$0xff] }
 0x2e6   : > { %1365 = vst.msk [vmem:[#allocation2 + $0x60] sm:$0xff] %vm1352_vm2, %v1332_v52 }
 0x2e7   : > { %1366 = vst.msk [vmem:[#allocation2 + $0x68] sm:$0xff] %vm1352_vm2, %v1333_v4  ;;  %v3438_v4 = vunpack.c.l.bf16 %v2596_v19 }
 0x2e8   : > { %1367 = vst.msk [vmem:[#allocation2 + $0x70] sm:$0xff] %vm1352_vm2, %v1334_v51 }
 0x2e9   : > { %1368 = vst.msk [vmem:[#allocation2 + $0x78] sm:$0xff] %vm1352_vm2, %v1335_v36 }
 0x2ea   : > { %1369 = vst.msk [vmem:[#allocation2 + $0x80] sm:$0xff] %vm1352_vm2, %v1336_v55  ;;  %v3441_v55 = vld [vmem:[#allocation4_spill] sm:$0xff] }
 0x2eb   : > { %1370 = vst.msk [vmem:[#allocation2 + $0x88] sm:$0xff] %vm1352_vm2, %v1337_v18  ;;  %v3442_v3 = vunpack.c.l.bf16 %v3441_v55 }
 0x2ec   : > { %1371 = vst.msk [vmem:[#allocation2 + $0x90] sm:$0xff] %vm1352_vm2, %v1338_v1 }
 0x2ed   : > { %1372 = vst.msk [vmem:[#allocation2 + $0x98] sm:$0xff] %vm1352_vm2, %v1339_v24 }
 0x2ee   : > { %1373 = vst.msk [vmem:[#allocation2 + $0xa0] sm:$0xff] %vm1352_vm2, %v1340_v7 }
 0x2ef   : > { %1374 = vst.msk [vmem:[#allocation2 + $0xa8] sm:$0xff] %vm1352_vm2, %v1341_v2  ;;  %v3446_v2 = vunpack.c.l.bf16 %v3445_v32 }
 0x2f0   : > { %1375 = vst.msk [vmem:[#allocation2 + $0xb0] sm:$0xff] %vm1352_vm2, %v1342_v35 }
 0x2f1   : > { %1376 = vst.msk [vmem:[#allocation2 + $0xb8] sm:$0xff] %vm1352_vm2, %v1343_v53  ;;  %v3447_v53 = vunpack.c.h.bf16 %v3445_v32 }
 0x2f2   : > { %1377 = vst.msk [vmem:[#allocation2 + $0xc0] sm:$0xff] %vm1352_vm2, %v1344_v8 }
 0x2f3   : > { %1378 = vst.msk [vmem:[#allocation2 + $0xc8] sm:$0xff] %vm1352_vm2, %v1345_v49 }
 0x2f4   : > { %1379 = vst.msk [vmem:[#allocation2 + $0xd0] sm:$0xff] %vm1352_vm2, %v1346_v9  ;;  %2177 = vmatmul.msk.bf16.gmra.mxu3 %vm669_vm0, %v2573_v60  ;;  %v3028_v60 = vld [vmem:[%s487_s14] ss:$0 sm:$0xff]  ;;  %v3450_v9 = vunpack.c.l.bf16 %v3449_v28 }
 0x2f5   : > { %1380 = vst.msk [vmem:[#allocation2 + $0xd8] sm:$0xff] %vm1352_vm2, %v1347_v21 }
 0x2f6   : > { %1381 = vst.msk [vmem:[#allocation2 + $0xe0] sm:$0xff] %vm1352_vm2, %v1348_v62  ;;  %v3451_v62 = vunpack.c.h.bf16 %v3449_v28 }
 0x2f7   : > { %1382 = vst.msk [vmem:[#allocation2 + $0xe8] sm:$0xff] %vm1352_vm2, %v1349_v17 }
 0x2f8   : > { %1383 = vst.msk [vmem:[#allocation2 + $0xf0] sm:$0xff] %vm1352_vm2, %v1350_v6 }
 0x2f9   : > { %1384 = vst.msk [vmem:[#allocation2 + $0xf8] sm:$0xff] %vm1352_vm2, %v1351_v40  ;;  %v3452_v40 = vld [vmem:[#allocation19_spill] sm:$0xff] }
 0x304   : > { %2178 = vmatmul.msk.bf16.gmra.mxu3 %vm669_vm0, %v2591_v16 }
 0x314   : > { %2179 = vmatmul.msk.bf16.gmra.mxu3 %vm669_vm0, %v2609_v39  ;;  %v3432_v39 = vunpack.c.l.bf16 %v2538_v25 }
 0x324   : > { %2180 = vmatmul.msk.bf16.gmra.mxu3 %vm669_vm0, %v2627_v0 }
 0x334   : > { %2181 = vmatmul.msk.bf16.gmra.mxu3 %vm669_vm0, %v2645_v30 }
 0x344   : > { %2182 = vmatmul.msk.bf16.gmra.mxu3 %vm669_vm0, %v2663_v57 }
 0x354   : > { %2183 = vmatmul.msk.bf16.gmra.mxu3 %vm669_vm0, %v2679_v13  ;;  %v3433_v13 = vunpack.c.h.bf16 %v2538_v25  ;;  %v3435_v25 = vunpack.c.h.bf16 %v2556_v44  ;;  %v3437_v44 = vunpack.c.h.bf16 %v2578_v63  ;;  %v3439_v63 = vunpack.c.h.bf16 %v2596_v19 }
 0x355   : > { %v3443_v19 = vunpack.c.h.bf16 %v3441_v55 }
 0x364   : > { %2184 = vmatmul.msk.bf16.gmra.mxu3 %vm669_vm0, %v2694_v38 }
 0x367   : > { %v1410_v16 = vpop.f32.mrf.mxu3 }
 0x368   : > { %v1490_v0 = vadd.f32 %v1410_v16, %v3432_v39  ;;  %v3453_v39 = vld [vmem:[#allocation7_spill] sm:$0xff] }
 0x36a   : > { %v1526_v30 = vadd.f32 %v3028_v60, %v1490_v0  ;;  %v3454_v0 = vunpack.c.l.bf16 %v3453_v39 }
 0x36c   : > { %1558 = vst.msk [vmem:[%s2447_s29] sm:$0xff] %vm669_vm0, %v1526_v30 }
 0x36f   : > { %v1412_v57 = vpop.f32.mrf.mxu3 }
 0x370   : > { %v1491_v48 = vadd.f32 %v1412_v57, %v3433_v13 }
 0x372   : > { %v1527_v38 = vadd.f32 %v3028_v60, %v1491_v48  ;;  %v3455_v48 = vunpack.c.h.bf16 %v3453_v39  ;;  %v3474_v39 = vld [vmem:[#allocation16_spill] sm:$0xff] }
 0x374   : > { %1559 = vst.msk [vmem:[%s2447_s29 + $0x8] sm:$0xff] %vm669_vm0, %v1527_v38  ;;  %2185 = vmatmul.msk.bf16.gmra.mxu3 %vm669_vm0, %v2722_v10 }
 0x377   : > { %v1415_v46 = vpop.f32.mrf.mxu3 }
 0x378   : > { %v1492_v27 = vadd.f32 %v1415_v46, %v3434_v29 }
 0x37a   : > { %v1528_v47 = vadd.f32 %v3028_v60, %v1492_v27  ;;  %v3456_v27 = vld [vmem:[#allocation8_spill] sm:$0xff] }
 0x37c   : > { %1560 = vst.msk [vmem:[%s2447_s29 + $0x10] sm:$0xff] %vm669_vm0, %v1528_v47  ;;  %v3457_v47 = vunpack.c.l.bf16 %v3456_v27 }
 0x37f   : > { %v1417_v45 = vpop.f32.mrf.mxu3 }
 0x380   : > { %v1493_v33 = vadd.f32 %v1417_v45, %v3435_v25 }
 0x382   : > { %v1529_v61 = vadd.f32 %v3028_v60, %v1493_v33 }
 0x384   : > { %1561 = vst.msk [vmem:[%s2447_s29 + $0x18] sm:$0xff] %vm669_vm0, %v1529_v61  ;;  %2186 = vmatmul.msk.bf16.gmra.mxu3 %vm669_vm0, %v2743_v58  ;;  %v3458_v61 = vunpack.c.h.bf16 %v3456_v27  ;;  %v3477_v27 = vld [vmem:[#allocation18_spill] sm:$0xff] }
 0x387   : > { %v1420_v10 = vpop.f32.mrf.mxu3 }
 0x388   : > { %v1494_v5 = vadd.f32 %v1420_v10, %v3436_v31 }
 0x38a   : > { %v1530_v22 = vadd.f32 %v3028_v60, %v1494_v5 }
 0x38c   : > { %1562 = vst.msk [vmem:[%s2447_s29 + $0x20] sm:$0xff] %vm669_vm0, %v1530_v22  ;;  %v3459_v22 = vld [vmem:[#allocation9_spill] sm:$0xff] }
 0x38f   : > { %v1422_v34 = vpop.f32.mrf.mxu3 }
 0x390   : > { %v1495_v52 = vadd.f32 %v1422_v34, %v3437_v44  ;;  %v3460_v34 = vunpack.c.l.bf16 %v3459_v22 }
 0x392   : > { %v1531_v37 = vadd.f32 %v3028_v60, %v1495_v52 }
 0x394   : > { %1563 = vst.msk [vmem:[%s2447_s29 + $0x28] sm:$0xff] %vm669_vm0, %v1531_v37  ;;  %2187 = vmatmul.msk.bf16.gmra.mxu3 %vm669_vm0, %v2764_v59 }
 0x397   : > { %v1425_v58 = vpop.f32.mrf.mxu3 }
 0x398   : > { %v1496_v43 = vadd.f32 %v1425_v58, %v3438_v4  ;;  %v3461_v58 = vunpack.c.h.bf16 %v3459_v22 }
 0x39a   : > { %v1532_v11 = vadd.f32 %v3028_v60, %v1496_v43 }
 0x39c   : > { %1564 = vst.msk [vmem:[%s2447_s29 + $0x30] sm:$0xff] %vm669_vm0, %v1532_v11 }
 0x39f   : > { %v1427_v51 = vpop.f32.mrf.mxu3 }
 0x3a0   : > { %v1497_v50 = vadd.f32 %v1427_v51, %v3439_v63  ;;  %v3462_v51 = vld [vmem:[#allocation10_spill] sm:$0xff] }
 0x3a1   : > { %v3463_v63 = vunpack.c.l.bf16 %v3462_v51 }
 0x3a2   : > { %v1533_v36 = vadd.f32 %v3028_v60, %v1497_v50 }
 0x3a4   : > { %1565 = vst.msk [vmem:[%s2447_s29 + $0x38] sm:$0xff] %vm669_vm0, %v1533_v36  ;;  %2188 = vmatmul.msk.bf16.gmra.mxu3 %vm669_vm0, %v3440_v14 }
 0x3a7   : > { %v1430_v59 = vpop.f32.mrf.mxu3 }
 0x3a8   : > { %v1498_v18 = vadd.f32 %v1430_v59, %v3442_v3  ;;  %v3464_v59 = vunpack.c.h.bf16 %v3462_v51 }
 0x3aa   : > { %v1534_v42 = vadd.f32 %v3028_v60, %v1498_v18 }
 0x3ac   : > { %1566 = vst.msk [vmem:[%s2447_s29 + $0x40] sm:$0xff] %vm669_vm0, %v1534_v42  ;;  %v3465_v42 = vld [vmem:[#allocation11_spill] sm:$0xff] }
 0x3af   : > { %v1432_v1 = vpop.f32.mrf.mxu3 }
 0x3b0   : > { %v1499_v12 = vadd.f32 %v1432_v1, %v3443_v19  ;;  %v3466_v1 = vunpack.c.l.bf16 %v3465_v42 }
 0x3b2   : > { %v1535_v24 = vadd.f32 %v3028_v60, %v1499_v12 }
 0x3b4   : > { %1567 = vst.msk [vmem:[%s2447_s29 + $0x48] sm:$0xff] %vm669_vm0, %v1535_v24  ;;  %2189 = vmatmul.msk.bf16.gmra.mxu3 %vm669_vm0, %v3444_v20  ;;  %v3467_v20 = vunpack.c.h.bf16 %v3465_v42 }
 0x3b7   : > { %v1435_v7 = vpop.f32.mrf.mxu3 }
 0x3b8   : > { %v1500_v23 = vadd.f32 %v1435_v7, %v3446_v2 }
 0x3ba   : > { %v1536_v35 = vadd.f32 %v3028_v60, %v1500_v23  ;;  %v3468_v23 = vld [vmem:[#allocation12_spill] sm:$0xff] }
 0x3bc   : > { %1568 = vst.msk [vmem:[%s2447_s29 + $0x50] sm:$0xff] %vm669_vm0, %v1536_v35  ;;  %v3469_v35 = vunpack.c.l.bf16 %v3468_v23 }
 0x3bf   : > { %v1437_v54 = vpop.f32.mrf.mxu3 }
 0x3c0   : > { %v1501_v26 = vadd.f32 %v1437_v54, %v3447_v53 }
 0x3c2   : > { %v1537_v8 = vadd.f32 %v3028_v60, %v1501_v26 }
 0x3c4   : > { %1569 = vst.msk [vmem:[%s2447_s29 + $0x58] sm:$0xff] %vm669_vm0, %v1537_v8  ;;  %2190 = vmatmul.msk.bf16.gmra.mxu3 %vm669_vm0, %v3448_v41  ;;  %v3470_v8 = vunpack.c.h.bf16 %v3468_v23 }
 0x3c7   : > { %v1440_v49 = vpop.f32.mrf.mxu3 }
 0x3c8   : > { %v1502_v56 = vadd.f32 %v1440_v49, %v3450_v9  ;;  %v3471_v9 = vld [vmem:[#allocation14_spill] sm:$0xff] }
 0x3ca   : > { %v1538_v21 = vadd.f32 %v3028_v60, %v1502_v56  ;;  %v3472_v56 = vunpack.c.l.bf16 %v3471_v9 }
 0x3cc   : > { %1570 = vst.msk [vmem:[%s2447_s29 + $0x60] sm:$0xff] %vm669_vm0, %v1538_v21 }
 0x3cf   : > { %v1442_v15 = vpop.f32.mrf.mxu3 }
 0x3d0   : > { %v1503_v17 = vadd.f32 %v1442_v15, %v3451_v62 }
 0x3d2   : > { %v1539_v6 = vadd.f32 %v3028_v60, %v1503_v17  ;;  %v3473_v17 = vunpack.c.h.bf16 %v3471_v9 }
 0x3d4   : > { %1571 = vst.msk [vmem:[%s2447_s29 + $0x68] sm:$0xff] %vm669_vm0, %v1539_v6  ;;  %2191 = vmatmul.msk.bf16.gmra.mxu3 %vm669_vm0, %v3452_v40 }
 0x3d7   : > { %v1445_v16 = vpop.f32.mrf.mxu3 }
 0x3d8   : > { %v1504_v30 = vadd.f32 %v1445_v16, %v3454_v0  ;;  %v3475_v0 = vunpack.c.l.bf16 %v3474_v39 }
 0x3da   : > { %v1540_v57 = vadd.f32 %v3028_v60, %v1504_v30 }
 0x3dc   : > { %1572 = vst.msk [vmem:[%s2447_s29 + $0x70] sm:$0xff] %vm669_vm0, %v1540_v57 }
 0x3df   : > { %v1447_v13 = vpop.f32.mrf.mxu3 }
 0x3e0   : > { %v1505_v38 = vadd.f32 %v1447_v13, %v3455_v48  ;;  %v3476_v48 = vunpack.c.h.bf16 %v3474_v39 }
 0x3e2   : > { %v1541_v46 = vadd.f32 %v3028_v60, %v1505_v38 }
 0x3e4   : > { %1573 = vst.msk [vmem:[%s2447_s29 + $0x78] sm:$0xff] %vm669_vm0, %v1541_v46 }
 0x3e7   : > { %v1450_v29 = vpop.f32.mrf.mxu3 }
 0x3e8   : > { %v1506_v45 = vadd.f32 %v1450_v29, %v3457_v47  ;;  %v3478_v47 = vunpack.c.l.bf16 %v3477_v27 }
 0x3ea   : > { %v1542_v25 = vadd.f32 %v3028_v60, %v1506_v45 }
 0x3ec   : > { %1574 = vst.msk [vmem:[%s2447_s29 + $0x80] sm:$0xff] %vm669_vm0, %v1542_v25 }
 0x3ef   : > { %v1452_v33 = vpop.f32.mrf.mxu3 }
 0x3f0   : > { %v1507_v10 = vadd.f32 %v1452_v33, %v3458_v61  ;;  %v3479_v61 = vunpack.c.h.bf16 %v3477_v27 }
 0x3f2   : > { %v1543_v31 = vadd.f32 %v3028_v60, %v1507_v10 }
 0x3f4   : > { %1575 = vst.msk [vmem:[%s2447_s29 + $0x88] sm:$0xff] %vm669_vm0, %v1543_v31 }
 0x3f7   : > { %v1455_v5 = vpop.f32.mrf.mxu3 }
 0x3f8   : > { %v1508_v44 = vadd.f32 %v1455_v5, %v3460_v34 }
 0x3fa   : > { %v1544_v52 = vadd.f32 %v3028_v60, %v1508_v44 }
 0x3fc   : > { %1576 = vst.msk [vmem:[%s2447_s29 + $0x90] sm:$0xff] %vm669_vm0, %v1544_v52 }
 0x3ff   : > { %v1457_v37 = vpop.f32.mrf.mxu3 }
 0x400   : > { %v1509_v4 = vadd.f32 %v1457_v37, %v3461_v58 }
 0x402   : > { %v1545_v43 = vadd.f32 %v3028_v60, %v1509_v4 }
 0x404   : > { %1577 = vst.msk [vmem:[%s2447_s29 + $0x98] sm:$0xff] %vm669_vm0, %v1545_v43 }
 0x407   : > { %v1460_v11 = vpop.f32.mrf.mxu3 }
 0x408   : > { %v1510_v50 = vadd.f32 %v1460_v11, %v3463_v63 }
 0x40a   : > { %v1546_v36 = vadd.f32 %v3028_v60, %v1510_v50 }
 0x40c   : > { %1578 = vst.msk [vmem:[%s2447_s29 + $0xa0] sm:$0xff] %vm669_vm0, %v1546_v36 }
 0x40f   : > { %v1462_v14 = vpop.f32.mrf.mxu3 }
 0x410   : > { %v1511_v55 = vadd.f32 %v1462_v14, %v3464_v59 }
 0x412   : > { %v1547_v3 = vadd.f32 %v3028_v60, %v1511_v55 }
 0x414   : > { %1579 = vst.msk [vmem:[%s2447_s29 + $0xa8] sm:$0xff] %vm669_vm0, %v1547_v3 }
 0x417   : > { %v1465_v18 = vpop.f32.mrf.mxu3 }
 0x418   : > { %v1512_v19 = vadd.f32 %v1465_v18, %v3466_v1 }
 0x41a   : > { %v1548_v12 = vadd.f32 %v3028_v60, %v1512_v19 }
 0x41c   : > { %1580 = vst.msk [vmem:[%s2447_s29 + $0xb0] sm:$0xff] %vm669_vm0, %v1548_v12 }
 0x41f   : > { %v1467_v24 = vpop.f32.mrf.mxu3 }
 0x420   : > { %v1513_v7 = vadd.f32 %v1467_v24, %v3467_v20 }
 0x422   : > { %v1549_v32 = vadd.f32 %v3028_v60, %v1513_v7 }
 0x424   : > { %1581 = vst.msk [vmem:[%s2447_s29 + $0xb8] sm:$0xff] %vm669_vm0, %v1549_v32 }
 0x427   : > { %v1470_v2 = vpop.f32.mrf.mxu3 }
 0x428   : > { %v1514_v54 = vadd.f32 %v1470_v2, %v3469_v35 }
 0x42a   : > { %v1550_v53 = vadd.f32 %v3028_v60, %v1514_v54 }
 0x42c   : > { %1582 = vst.msk [vmem:[%s2447_s29 + $0xc0] sm:$0xff] %vm669_vm0, %v1550_v53 }
 0x42f   : > { %v1472_v26 = vpop.f32.mrf.mxu3 }
 0x430   : > { %v1515_v41 = vadd.f32 %v1472_v26, %v3470_v8 }
 0x432   : > { %v1551_v49 = vadd.f32 %v3028_v60, %v1515_v41 }
 0x434   : > { %1583 = vst.msk [vmem:[%s2447_s29 + $0xc8] sm:$0xff] %vm669_vm0, %v1551_v49 }
 0x437   : > { %v1475_v28 = vpop.f32.mrf.mxu3 }
 0x438   : > { %v1516_v21 = vadd.f32 %v1475_v28, %v3472_v56 }
 0x43a   : > { %v1552_v15 = vadd.f32 %v3028_v60, %v1516_v21 }
 0x43c   : > { %1584 = vst.msk [vmem:[%s2447_s29 + $0xd0] sm:$0xff] %vm669_vm0, %v1552_v15 }
 0x43f   : > { %v1477_v62 = vpop.f32.mrf.mxu3 }
 0x440   : > { %v1517_v6 = vadd.f32 %v1477_v62, %v3473_v17 }
 0x442   : > { %v1553_v40 = vadd.f32 %v3028_v60, %v1517_v6 }
 0x444   : > { %1585 = vst.msk [vmem:[%s2447_s29 + $0xd8] sm:$0xff] %vm669_vm0, %v1553_v40 }
 0x447   : > { %v1480_v16 = vpop.f32.mrf.mxu3 }
 0x448   : > { %v1518_v30 = vadd.f32 %v1480_v16, %v3475_v0 }
 0x44a   : > { %v1554_v57 = vadd.f32 %v3028_v60, %v1518_v30 }
 0x44c   : > { %1586 = vst.msk [vmem:[%s2447_s29 + $0xe0] sm:$0xff] %vm669_vm0, %v1554_v57 }
 0x44f   : > { %v1482_v13 = vpop.f32.mrf.mxu3 }
 0x450   : > { %v1519_v38 = vadd.f32 %v1482_v13, %v3476_v48 }
 0x452   : > { %v1555_v46 = vadd.f32 %v3028_v60, %v1519_v38 }
 0x454   : > { %1587 = vst.msk [vmem:[%s2447_s29 + $0xe8] sm:$0xff] %vm669_vm0, %v1555_v46 }
 0x457   : > { %v1485_v29 = vpop.f32.mrf.mxu3 }
 0x458   : > { %v1520_v45 = vadd.f32 %v1485_v29, %v3478_v47 }
 0x45a   : > { %v1556_v25 = vadd.f32 %v3028_v60, %v1520_v45 }
 0x45c   : > { %1588 = vst.msk [vmem:[%s2447_s29 + $0xf0] sm:$0xff] %vm669_vm0, %v1556_v25 }
 0x45f   : > { %v1487_v33 = vpop.f32.mrf.mxu3 }
 0x460   : > { %v1521_v10 = vadd.f32 %v1487_v33, %v3479_v61  ;;  %1593 = sbr.rel (%p2192_p8) target bundleno = 1323 (0x52b), region = 64 }
 0x462   : > { %v1557_v31 = vadd.f32 %v3028_v60, %v1521_v10 }
 0x464   : > { %1589 = vst.msk [vmem:[%s2447_s29 + $0xf8] sm:$0xff] %vm669_vm0, %v1557_v31 }
 0x465   : > { %v2242_v5 = vld [vmem:[%s3347_s7] sm:$0xff]  ;;  %v1595_v34 = vld [vmem:[#allocation2 + $0x8] sm:$0xff]  ;;  %v1596_v50 = vld [vmem:[#allocation2 + $0x10] sm:$0xff] }
 0x466   : > { %v1594_v22 = vld [vmem:[#allocation2] sm:$0xff]  ;;  %v1603_v37 = vld [vmem:[#allocation2 + $0x48] sm:$0xff]  ;;  %1709 = vmatpush.bf16.msra.mxu0 %v2242_v5  ;;  %2243 = vmatpush.bf16.msra.mxu1 %v2242_v5  ;;  %v1597_v36 = vld [vmem:[#allocation2 + $0x18] sm:$0xff] }
 0x467   : > { %v1626_v44 = vpack.c.bf16 %v1595_v34, %v1594_v22  ;;  %v1602_v52 = vld [vmem:[#allocation2 + $0x40] sm:$0xff]  ;;  %v1611_v43 = vld [vmem:[#allocation2 + $0x88] sm:$0xff]  ;;  %2244 = vmatpush.bf16.msra.mxu2 %v2242_v5  ;;  %2245 = vmatpush.bf16.msra.mxu3 %v2242_v5  ;;  %v1604_v14 = vld [vmem:[#allocation2 + $0x50] sm:$0xff]  ;;  %v1627_v1 = vpack.c.bf16 %v1597_v36, %v1596_v50 }
 0x468   : > { %v1610_v58 = vld [vmem:[#allocation2 + $0x80] sm:$0xff]  ;;  %v1630_v4 = vpack.c.bf16 %v1603_v37, %v1602_v52  ;;  %v1619_v11 = vld [vmem:[#allocation2 + $0xc8] sm:$0xff]  ;;  %v1605_v59 = vld [vmem:[#allocation2 + $0x58] sm:$0xff] }
 0x469   : > { %v1618_v60 = vld [vmem:[#allocation2 + $0xc0] sm:$0xff]  ;;  %v1634_v51 = vpack.c.bf16 %v1611_v43, %v1610_v58  ;;  %2197 = vmatmul.msk.bf16.vlgmr.msra.gmra.mxu0 %vm1352_vm2, %v1626_v44  ;;  %v1612_v55 = vld [vmem:[#allocation2 + $0x90] sm:$0xff]  ;;  %v1613_v3 = vld [vmem:[#allocation2 + $0x98] sm:$0xff]  ;;  %v1631_v19 = vpack.c.bf16 %v1605_v59, %v1604_v14 }
 0x46a   : > { %v1638_v63 = vpack.c.bf16 %v1619_v11, %v1618_v60  ;;  %2201 = vmatmul.msk.bf16.vlgmr.msra.gmra.mxu1 %vm1352_vm2, %v1630_v4  ;;  %v1620_v18 = vld [vmem:[#allocation2 + $0xd0] sm:$0xff]  ;;  %v1621_v42 = vld [vmem:[#allocation2 + $0xd8] sm:$0xff]  ;;  %v1635_v12 = vpack.c.bf16 %v1613_v3, %v1612_v55  ;;  %v1598_v20 = vld [vmem:[#allocation2 + $0x20] sm:$0xff] }
 0x46b   : > { %2205 = vmatmul.msk.bf16.vlgmr.msra.gmra.mxu2 %vm1352_vm2, %v1634_v51  ;;  %v1639_v24 = vpack.c.bf16 %v1621_v42, %v1620_v18  ;;  %v1599_v7 = vld [vmem:[#allocation2 + $0x28] sm:$0xff]  ;;  %v1606_v32 = vld [vmem:[#allocation2 + $0x60] sm:$0xff]  ;;  %v1600_v28 = vld [vmem:[#allocation2 + $0x30] sm:$0xff] }
 0x46c   : > { %2209 = vmatmul.msk.bf16.vlgmr.msra.gmra.mxu3 %vm1352_vm2, %v1638_v63  ;;  %v1607_v2 = vld [vmem:[#allocation2 + $0x68] sm:$0xff]  ;;  %v1614_v23 = vld [vmem:[#allocation2 + $0xa0] sm:$0xff]  ;;  %v1628_v26 = vpack.c.bf16 %v1599_v7, %v1598_v20  ;;  %v1601_v9 = vld [vmem:[#allocation2 + $0x38] sm:$0xff] }
 0x46d   : > { %v1615_v35 = vld [vmem:[#allocation2 + $0xa8] sm:$0xff]  ;;  %v1622_v54 = vld [vmem:[#allocation2 + $0xe0] sm:$0xff]  ;;  %v1632_v8 = vpack.c.bf16 %v1607_v2, %v1606_v32  ;;  %v1608_v56 = vld [vmem:[#allocation2 + $0x70] sm:$0xff]  ;;  %v1629_v40 = vpack.c.bf16 %v1601_v9, %v1600_v28 }
 0x46e   : > { %v1623_v53 = vld [vmem:[#allocation2 + $0xe8] sm:$0xff]  ;;  %v1636_v41 = vpack.c.bf16 %v1615_v35, %v1614_v23  ;;  %v1609_v21 = vld [vmem:[#allocation2 + $0x78] sm:$0xff]  ;;  %v1616_v15 = vld [vmem:[#allocation2 + $0xb0] sm:$0xff] }
 0x46f   : > { %v1640_v49 = vpack.c.bf16 %v1623_v53, %v1622_v54  ;;  %v1617_v62 = vld [vmem:[#allocation2 + $0xb8] sm:$0xff]  ;;  %v1624_v17 = vld [vmem:[#allocation2 + $0xf0] sm:$0xff]  ;;  %v1633_v16 = vpack.c.bf16 %v1609_v21, %v1608_v56  ;;  %v3227_v30 = vld [vmem:[%s3348_s8] ss:$0 sm:$0xff] }
 0x470   : > { %v1625_v6 = vld [vmem:[#allocation2 + $0xf8] sm:$0xff]  ;;  %v1637_v39 = vpack.c.bf16 %v1617_v62, %v1616_v15 }
 0x471   : > { %v1641_v0 = vpack.c.bf16 %v1625_v6, %v1624_v17 }
 0x479   : > { %2198 = vmatmul.msk.bf16.gmra.mxu0 %vm1352_vm2, %v1627_v1 }
 0x47a   : > { %2202 = vmatmul.msk.bf16.gmra.mxu1 %vm1352_vm2, %v1631_v19 }
 0x47b   : > { %2206 = vmatmul.msk.bf16.gmra.mxu2 %vm1352_vm2, %v1635_v12 }
 0x47c   : > { %2210 = vmatmul.msk.bf16.gmra.mxu3 %vm1352_vm2, %v1639_v24 }
 0x489   : > { %2199 = vmatmul.msk.bf16.gmra.mxu0 %vm1352_vm2, %v1628_v26 }
 0x48a   : > { %2203 = vmatmul.msk.bf16.gmra.mxu1 %vm1352_vm2, %v1632_v8 }
 0x48b   : > { %2207 = vmatmul.msk.bf16.gmra.mxu2 %vm1352_vm2, %v1636_v41 }
 0x48c   : > { %2211 = vmatmul.msk.bf16.gmra.mxu3 %vm1352_vm2, %v1640_v49 }
 0x499   : > { %2200 = vmatmul.msk.bf16.gmra.mxu0 %vm1352_vm2, %v1629_v40 }
 0x49a   : > { %2204 = vmatmul.msk.bf16.gmra.mxu1 %vm1352_vm2, %v1633_v16 }
 0x49b   : > { %2208 = vmatmul.msk.bf16.gmra.mxu2 %vm1352_vm2, %v1637_v39 }
 0x49c   : > { %2212 = vmatmul.msk.bf16.gmra.mxu3 %vm1352_vm2, %v1641_v0 }
 0x4e6   : > { %v1711_v57 = vpop.f32.mrf.mxu0 }
 0x4e7   : > { %v1731_v13 = vpop.f32.mrf.mxu1  ;;  %v1712_v48 = vadd.f32 %v3227_v30, %v1711_v57 }
 0x4e8   : > { %v1732_v38 = vadd.f32 %v3227_v30, %v1731_v13 }
 0x4e9   : > { %1791 = vst.msk [vmem:[%s2440_s19] sm:$0xff] %vm1352_vm2, %v1712_v48 }
 0x4ea   : > { %1799 = vst.msk [vmem:[%s2440_s19 + $0x40] sm:$0xff] %vm1352_vm2, %v1732_v38 }
 0x4ee   : > { %v1751_v46 = vpop.f32.mrf.mxu2  ;;  %v1713_v45 = vpop.f32.mrf.mxu0 }
 0x4ef   : > { %v1771_v29 = vpop.f32.mrf.mxu3  ;;  %v1752_v27 = vadd.f32 %v3227_v30, %v1751_v46  ;;  %v1733_v25 = vpop.f32.mrf.mxu1  ;;  %v1714_v33 = vadd.f32 %v3227_v30, %v1713_v45 }
 0x4f0   : > { %v1772_v47 = vadd.f32 %v3227_v30, %v1771_v29  ;;  %v1734_v61 = vadd.f32 %v3227_v30, %v1733_v25 }
 0x4f1   : > { %1807 = vst.msk [vmem:[%s2440_s19 + $0x80] sm:$0xff] %vm1352_vm2, %v1752_v27 }
 0x4f2   : > { %1815 = vst.msk [vmem:[%s2440_s19 + $0xc0] sm:$0xff] %vm1352_vm2, %v1772_v47 }
 0x4f3   : > { %1792 = vst.msk [vmem:[%s2440_s19 + $0x8] sm:$0xff] %vm1352_vm2, %v1714_v33 }
 0x4f4   : > { %1800 = vst.msk [vmem:[%s2440_s19 + $0x48] sm:$0xff] %vm1352_vm2, %v1734_v61 }
 0x4f6   : > { %v1753_v10 = vpop.f32.mrf.mxu2  ;;  %v1716_v34 = vpop.f32.mrf.mxu0 }
 0x4f7   : > { %v1773_v31 = vpop.f32.mrf.mxu3  ;;  %v1754_v5 = vadd.f32 %v3227_v30, %v1753_v10  ;;  %v1736_v44 = vpop.f32.mrf.mxu1  ;;  %v1717_v52 = vadd.f32 %v3227_v30, %v1716_v34 }
 0x4f8   : > { %v1774_v22 = vadd.f32 %v3227_v30, %v1773_v31  ;;  %v1737_v37 = vadd.f32 %v3227_v30, %v1736_v44 }
 0x4f9   : > { %1808 = vst.msk [vmem:[%s2440_s19 + $0x88] sm:$0xff] %vm1352_vm2, %v1754_v5 }
 0x4fa   : > { %1816 = vst.msk [vmem:[%s2440_s19 + $0xc8] sm:$0xff] %vm1352_vm2, %v1774_v22 }
 0x4fb   : > { %1793 = vst.msk [vmem:[%s2440_s19 + $0x10] sm:$0xff] %vm1352_vm2, %v1717_v52 }
 0x4fc   : > { %1801 = vst.msk [vmem:[%s2440_s19 + $0x50] sm:$0xff] %vm1352_vm2, %v1737_v37 }
 0x4fe   : > { %v1756_v58 = vpop.f32.mrf.mxu2  ;;  %v1718_v11 = vpop.f32.mrf.mxu0 }
 0x4ff   : > { %v1776_v4 = vpop.f32.mrf.mxu3  ;;  %v1757_v43 = vadd.f32 %v3227_v30, %v1756_v58  ;;  %v1738_v51 = vpop.f32.mrf.mxu1  ;;  %v1719_v63 = vadd.f32 %v3227_v30, %v1718_v11 }
 0x500   : > { %v1777_v60 = vadd.f32 %v3227_v30, %v1776_v4  ;;  %v1739_v50 = vadd.f32 %v3227_v30, %v1738_v51 }
 0x501   : > { %1809 = vst.msk [vmem:[%s2440_s19 + $0x90] sm:$0xff] %vm1352_vm2, %v1757_v43 }
 0x502   : > { %1817 = vst.msk [vmem:[%s2440_s19 + $0xd0] sm:$0xff] %vm1352_vm2, %v1777_v60 }
 0x503   : > { %1794 = vst.msk [vmem:[%s2440_s19 + $0x18] sm:$0xff] %vm1352_vm2, %v1719_v63 }
 0x504   : > { %1802 = vst.msk [vmem:[%s2440_s19 + $0x58] sm:$0xff] %vm1352_vm2, %v1739_v50 }
 0x506   : > { %v1758_v36 = vpop.f32.mrf.mxu2  ;;  %v1721_v3 = vpop.f32.mrf.mxu0 }
 0x507   : > { %v1778_v14 = vpop.f32.mrf.mxu3  ;;  %v1759_v59 = vadd.f32 %v3227_v30, %v1758_v36  ;;  %v1741_v18 = vpop.f32.mrf.mxu1  ;;  %v1722_v42 = vadd.f32 %v3227_v30, %v1721_v3 }
 0x508   : > { %v1779_v55 = vadd.f32 %v3227_v30, %v1778_v14  ;;  %v1742_v1 = vadd.f32 %v3227_v30, %v1741_v18 }
 0x509   : > { %1810 = vst.msk [vmem:[%s2440_s19 + $0x98] sm:$0xff] %vm1352_vm2, %v1759_v59 }
 0x50a   : > { %1818 = vst.msk [vmem:[%s2440_s19 + $0xd8] sm:$0xff] %vm1352_vm2, %v1779_v55 }
 0x50b   : > { %1795 = vst.msk [vmem:[%s2440_s19 + $0x20] sm:$0xff] %vm1352_vm2, %v1722_v42 }
 0x50c   : > { %1803 = vst.msk [vmem:[%s2440_s19 + $0x60] sm:$0xff] %vm1352_vm2, %v1742_v1 }
 0x50e   : > { %v1761_v19 = vpop.f32.mrf.mxu2  ;;  %v1723_v7 = vpop.f32.mrf.mxu0 }
 0x50f   : > { %v1781_v12 = vpop.f32.mrf.mxu3  ;;  %v1762_v24 = vadd.f32 %v3227_v30, %v1761_v19  ;;  %v1743_v32 = vpop.f32.mrf.mxu1  ;;  %v1724_v2 = vadd.f32 %v3227_v30, %v1723_v7 }
 0x510   : > { %v1782_v20 = vadd.f32 %v3227_v30, %v1781_v12  ;;  %v1744_v23 = vadd.f32 %v3227_v30, %v1743_v32 }
 0x511   : > { %1811 = vst.msk [vmem:[%s2440_s19 + $0xa0] sm:$0xff] %vm1352_vm2, %v1762_v24 }
 0x512   : > { %1819 = vst.msk [vmem:[%s2440_s19 + $0xe0] sm:$0xff] %vm1352_vm2, %v1782_v20 }
 0x513   : > { %1796 = vst.msk [vmem:[%s2440_s19 + $0x28] sm:$0xff] %vm1352_vm2, %v1724_v2 }
 0x514   : > { %1804 = vst.msk [vmem:[%s2440_s19 + $0x68] sm:$0xff] %vm1352_vm2, %v1744_v23 }
 0x516   : > { %v1763_v35 = vpop.f32.mrf.mxu2  ;;  %v1726_v8 = vpop.f32.mrf.mxu0 }
 0x517   : > { %v1783_v54 = vpop.f32.mrf.mxu3  ;;  %v1764_v53 = vadd.f32 %v3227_v30, %v1763_v35  ;;  %v1746_v41 = vpop.f32.mrf.mxu1  ;;  %v1727_v49 = vadd.f32 %v3227_v30, %v1726_v8 }
 0x518   : > { %v1784_v26 = vadd.f32 %v3227_v30, %v1783_v54  ;;  %v1747_v28 = vadd.f32 %v3227_v30, %v1746_v41 }
 0x519   : > { %1812 = vst.msk [vmem:[%s2440_s19 + $0xa8] sm:$0xff] %vm1352_vm2, %v1764_v53 }
 0x51a   : > { %1820 = vst.msk [vmem:[%s2440_s19 + $0xe8] sm:$0xff] %vm1352_vm2, %v1784_v26 }
 0x51b   : > { %1797 = vst.msk [vmem:[%s2440_s19 + $0x30] sm:$0xff] %vm1352_vm2, %v1727_v49 }
 0x51c   : > { %1805 = vst.msk [vmem:[%s2440_s19 + $0x70] sm:$0xff] %vm1352_vm2, %v1747_v28 }
 0x51e   : > { %v1766_v9 = vpop.f32.mrf.mxu2  ;;  %v1728_v62 = vpop.f32.mrf.mxu0 }
 0x51f   : > { %v1786_v56 = vpop.f32.mrf.mxu3  ;;  %v1767_v21 = vadd.f32 %v3227_v30, %v1766_v9  ;;  %v1748_v17 = vpop.f32.mrf.mxu1  ;;  %v1729_v6 = vadd.f32 %v3227_v30, %v1728_v62 }
 0x520   : > { %v1787_v15 = vadd.f32 %v3227_v30, %v1786_v56  ;;  %v1749_v40 = vadd.f32 %v3227_v30, %v1748_v17 }
 0x521   : > { %1813 = vst.msk [vmem:[%s2440_s19 + $0xb0] sm:$0xff] %vm1352_vm2, %v1767_v21 }
 0x522   : > { %1821 = vst.msk [vmem:[%s2440_s19 + $0xf0] sm:$0xff] %vm1352_vm2, %v1787_v15 }
 0x523   : > { %1798 = vst.msk [vmem:[%s2440_s19 + $0x38] sm:$0xff] %vm1352_vm2, %v1729_v6 }
 0x524   : > { %1806 = vst.msk [vmem:[%s2440_s19 + $0x78] sm:$0xff] %vm1352_vm2, %v1749_v40 }
 0x526   : > { %v1768_v16 = vpop.f32.mrf.mxu2 }
 0x527   : > { %v1788_v39 = vpop.f32.mrf.mxu3  ;;  %v1769_v0 = vadd.f32 %v3227_v30, %v1768_v16 }
 0x528   : > { %v1789_v57 = vadd.f32 %v3227_v30, %v1788_v39 }
 0x529   : > { %1814 = vst.msk [vmem:[%s2440_s19 + $0xb8] sm:$0xff] %vm1352_vm2, %v1769_v0 }
 0x52a   : > { %1822 = vst.msk [vmem:[%s2440_s19 + $0xf8] sm:$0xff] %vm1352_vm2, %v1789_v57 }
 0x52b PF: > { %s21_s17 = sadd.s32 1, %s2330_s17   ;;  %s3480_s26 = sld [smem:[#allocation3_spill]] }
 0x52c   : > { %p18_p9 = scmp.ge.s32.totalorder %s21_s17, 6   ;;  %s3481_s13 = smov %s2322_s15 }
 0x52d   : > { %s3482_s14 = smov %s2326_s16  ;;  %s3483_s15 = smov %s3486_s18 }
 0x52e   :  { %20 = sbr.rel (!%p18_p9) target bundleno = 4 (0x4), region = 126 }
 0x531   : > { %s3484_s16 = smov %s3480_s26 }

</bundles_post_ra>
